<compile_context>
chip_gen: v5e
topology: v5e:2x2
jax: 0.10.0
libtpu: 0.0.40
codegen_flags: <defaults>
</compile_context>

<pallas_src>
import math
import functools

import jax
import jax.numpy as jnp
from jax.experimental import pallas as pl
from jax.experimental.pallas import tpu as pltpu


def mha_kernel(x_ref, wqkv_ref, bqkv_ref, wo_ref, bo_ref, o_ref, ctx_ref,
               *, n_heads, head_dim):
    bblk, S, D = x_ref.shape
    M = bblk * S

    # Fused Q/K/V projection: one lane-dense MXU matmul, f32 accumulation,
    # single f32 bias add, single cast of the (M, 3D) result to bf16.
    x = x_ref[...].reshape(M, D)                        # bf16 (cast in wrapper)
    qkv = jnp.dot(x, wqkv_ref[...], preferred_element_type=jnp.float32)
    qkv = (qkv + bqkv_ref[...]).astype(jnp.bfloat16)    # (M, 3D)

    # Boolean causal mask (no materialized f32 (S, S) bias).
    row = jax.lax.broadcasted_iota(jnp.int32, (S, S), 0)
    col = jax.lax.broadcasted_iota(jnp.int32, (S, S), 1)
    causal = col > row
    neg_big = jnp.float32(-1e30)

    # Static unroll over (batch-in-block, head): static 32-lane slices of the
    # fused qkv result; each head's context lands lane-packed in ctx_ref so
    # the out-projection below is a single K=D matmul.
    # TODO(synk): for large S / n_heads, switch to a fori_loop + flash-style
    # KV grid axis to bound live ranges; unnecessary at these tiny shapes.
    for b in range(bblk):
        r0, r1 = b * S, (b + 1) * S
        for h in range(n_heads):
            c0 = h * head_dim
            q = qkv[r0:r1, c0:c0 + head_dim]            # (S, hd), pre-scaled
            k = qkv[r0:r1, D + c0:D + c0 + head_dim]
            v = qkv[r0:r1, 2 * D + c0:2 * D + c0 + head_dim]

            # q @ k^T: contract the last axes of both operands (no materialized
            # transpose of k), f32 accumulation on the MXU.
            s = jax.lax.dot_general(
                q, k, dimension_numbers=(((1,), (1,)), ((), ())),
                preferred_element_type=jnp.float32)      # (S, S)
            s = jnp.where(causal, neg_big, s)

            # Numerically stable softmax with deferred normalization: the
            # divide happens after P@V, on (S, hd) elements, as an EUP
            # reciprocal + VPU multiply.
            m = jnp.max(s, axis=-1, keepdims=True)
            p = jnp.exp(s - m)
            l = jnp.sum(p, axis=-1, keepdims=True)

            # TODO(synk): nn.Dropout(0.2) on attention weights is eval-mode
            # identity here (training mode would use pltpu.prng_* masking).
            o_h = jnp.dot(p.astype(jnp.bfloat16), v,
                          preferred_element_type=jnp.float32)
            o_h = o_h * pl.reciprocal(l, approx=True)

            ctx_ref[r0:r1, c0:c0 + head_dim] = o_h.astype(jnp.bfloat16)

    # Single lane-dense out-projection over the packed context (K = D), which
    # also performs the head recombination (replaces permute/reshape/concat).
    out = jnp.dot(ctx_ref[...], wo_ref[...], preferred_element_type=jnp.float32)
    out = out + bo_ref[...]
    o_ref[...] = out.reshape(bblk, S, D).astype(o_ref.dtype)


def multi_head_attention(x, params, *, n_heads):
    """x: [B, S, D] float32; params: dict of pre-transposed weights and biases."""
    B, S, D = x.shape
    head_dim = D // n_heads
    assert n_heads * head_dim == D
    scale = 1.0 / math.sqrt(head_dim)

    # Trace-time parameter prep (runs once under jit/XLA):
    #   - fold the softmax scale into Wq / bq,
    #   - fuse Q/K/V weights into one (D, 3D) bf16 matrix (lane-dense MXU op),
    #   - cast matmul weights to bf16 (native MXU rate, halves weight DMA).
    wqkv = jnp.concatenate(
        [params["wq"] * scale, params["wk"], params["wv"]], axis=1
    ).astype(jnp.bfloat16)                                    # (D, 3D)
    bqkv = jnp.concatenate(
        [params["bq"] * scale, params["bk"], params["bv"]], axis=1
    ).astype(jnp.float32)                                     # (1, 3D)
    wo = params["wo"].astype(jnp.bfloat16)                    # (D, D)
    bo = params["bo"].astype(jnp.float32)                     # (1, D)

    # Batch blocking: keep at most 2 "parallel" grid steps (one per v7x
    # TensorCore); fold the rest of the batch into the block so single-TC
    # chips (v5e/v6e) get bigger M and fewer per-step overheads.
    n_steps = 2 if (B >= 2 and B % 2 == 0) else 1
    bblk = B // n_steps

    # Halve input DMA / pipelined double buffers; output stays in x.dtype.
    x_bf16 = x.astype(jnp.bfloat16)

    kernel = functools.partial(mha_kernel, n_heads=n_heads, head_dim=head_dim)

    # Derive a VMEM limit from the actual footprint instead of reserving 48MiB.
    blk_bytes = (
        bblk * S * D * 2                 # x block (bf16)
        + bblk * S * D * x.dtype.itemsize  # out block
        + D * (3 * D) * 2 + D * D * 2    # wqkv + wo (bf16)
        + (3 * D + D) * 4                # biases (f32)
    )
    scratch_bytes = bblk * S * D * 2     # ctx scratch (bf16)
    vmem_limit = min(max(4 * (2 * blk_bytes + scratch_bytes), 4 << 20), 32 << 20)

    return pl.pallas_call(
        kernel,
        out_shape=jax.ShapeDtypeStruct((B, S, D), x.dtype),
        grid_spec=pltpu.PrefetchScalarGridSpec(
            num_scalar_prefetch=0,
            grid=(n_steps,),
            in_specs=[
                pl.BlockSpec((bblk, S, D), lambda i: (i, 0, 0)),   # x
                pl.BlockSpec((D, 3 * D), lambda i: (0, 0)),        # Wqkv
                pl.BlockSpec((1, 3 * D), lambda i: (0, 0)),        # bqkv
                pl.BlockSpec((D, D), lambda i: (0, 0)),            # Wo
                pl.BlockSpec((1, D), lambda i: (0, 0)),            # bo
            ],
            out_specs=pl.BlockSpec((bblk, S, D), lambda i: (i, 0, 0)),
            scratch_shapes=[pltpu.VMEM((bblk * S, D), jnp.bfloat16)],  # context
        ),
        compiler_params=pltpu.CompilerParams(
            dimension_semantics=("parallel",),
            vmem_limit_bytes=vmem_limit),
    )(x_bf16, wqkv, bqkv, wo, bo)


def reference_mha(x, params, *, n_heads):
    """Plain-JAX f32 reference mirroring the PyTorch forward (eval mode)."""
    B, S, D = x.shape
    hd = D // n_heads
    q = x @ params["wq"] + params["bq"][0]
    k = x @ params["wk"] + params["bk"][0]
    v = x @ params["wv"] + params["bv"][0]
    q = q.reshape(B, S, n_heads, hd).transpose(0, 2, 1, 3)
    k = k.reshape(B, S, n_heads, hd).transpose(0, 2, 1, 3)
    v = v.reshape(B, S, n_heads, hd).transpose(0, 2, 1, 3)
    scores = jnp.einsum("bhqd,bhkd->bhqk", q, k) / math.sqrt(hd)
    mask = jnp.triu(jnp.ones((S, S), dtype=bool), k=1)
    scores = jnp.where(mask, -jnp.inf, scores)
    w = jax.nn.softmax(scores, axis=-1)
    out = jnp.einsum("bhqk,bhkd->bhqd", w, v)
    out = out.transpose(0, 2, 1, 3).reshape(B, S, D)
    return out @ params["wo"] + params["bo"][0]


def init_params(key, d_model):
    ks = jax.random.split(key, 8)
    scale = 0.02
    p = {}
    for i, name in enumerate(["wq", "wk", "wv", "wo"]):
        p[name] = scale * jax.random.normal(ks[i], (d_model, d_model), jnp.float32)
    for i, name in enumerate(["bq", "bk", "bv", "bo"]):
        p[name] = scale * jax.random.normal(ks[4 + i], (1, d_model), jnp.float32)
    return p


if __name__ == "__main__":
    # Small shapes consistent with the module: d_model divisible by n_heads=4.
    # B=4 so batch-folding (bblk=2) and the 2 parallel grid steps both exercise.
    B, S, D, H = 4, 16, 128, 4

    key = jax.random.PRNGKey(0)
    kx, kp = jax.random.split(key)
    x = jax.random.normal(kx, (B, S, D), dtype=jnp.float32)
    params = init_params(kp, D)

    out = multi_head_attention(x, params, n_heads=H)
    out = jax.block_until_ready(out)

    ref = reference_mha(x, params, n_heads=H)
    assert out.shape == (B, S, D)
    # bf16 MXU operands + approx reciprocal => compare against the f32
    # reference with a correspondingly relaxed (but still meaningful) tolerance.
    assert jnp.allclose(out, ref, atol=1e-2, rtol=1e-2), "mismatch vs reference"

    print("KERNEL_OK")
</pallas_src>

<mosaic_0001>
module attributes {stable_mosaic.version = 11 : i64} {
  func.func @mha_kernel(%arg0: i32, %arg1: memref<2x16x128xbf16, #tpu.memory_space<vmem>>, %arg2: memref<128x384xbf16, #tpu.memory_space<vmem>>, %arg3: memref<1x384xf32, #tpu.memory_space<vmem>>, %arg4: memref<128x128xbf16, #tpu.memory_space<vmem>>, %arg5: memref<1x128xf32, #tpu.memory_space<vmem>>, %arg6: memref<2x16x128xf32, #tpu.memory_space<vmem>>, %arg7: memref<32x128xbf16, #tpu.memory_space<vmem>>) attributes {dimension_semantics = [#tpu.dimension_semantics<parallel>], iteration_bounds = array<i64: 2>, scalar_prefetch = 0 : i64, scratch_operands = 1 : i64, tpu.core_type = #tpu.core_type<tc>, window_params = [{transform_indices = @transform_0, window_bounds = array<i64: 2, 16, 128>}, {pipeline_mode = #tpu.pipeline_mode<synchronous>, transform_indices = @transform_1, window_bounds = array<i64: 128, 384>}, {pipeline_mode = #tpu.pipeline_mode<synchronous>, transform_indices = @transform_2, window_bounds = array<i64: 1, 384>}, {pipeline_mode = #tpu.pipeline_mode<synchronous>, transform_indices = @transform_3, window_bounds = array<i64: 128, 128>}, {pipeline_mode = #tpu.pipeline_mode<synchronous>, transform_indices = @transform_4, window_bounds = array<i64: 1, 128>}, {transform_indices = @transform_5, window_bounds = array<i64: 2, 16, 128>}]} {
    %c0 = arith.constant 0 : index
    %c0_0 = arith.constant 0 : index
    %c0_1 = arith.constant 0 : index
    %0 = vector.load %arg1[%c0, %c0_0, %c0_1] : memref<2x16x128xbf16, #tpu.memory_space<vmem>>, vector<2x16x128xbf16>
    %1 = vector.shape_cast %0 : vector<2x16x128xbf16> to vector<32x128xbf16>
    %c0_2 = arith.constant 0 : index
    %c0_3 = arith.constant 0 : index
    %2 = vector.load %arg2[%c0_2, %c0_3] : memref<128x384xbf16, #tpu.memory_space<vmem>>, vector<128x384xbf16>
    %cst = arith.constant dense<0.000000e+00> : vector<32x384xf32>
    %3 = tpu.matmul %1, %2, %cst {dimension_numbers = #tpu.dot_dimension_numbers<[1], [0], [0], [1], [0, 0, 1, 1], [], []>} : vector<32x128xbf16>, vector<128x384xbf16>, vector<32x384xf32> -> vector<32x384xf32>
    %c0_4 = arith.constant 0 : index
    %c0_5 = arith.constant 0 : index
    %4 = vector.load %arg3[%c0_4, %c0_5] : memref<1x384xf32, #tpu.memory_space<vmem>>, vector<1x384xf32>
    %5 = vector.broadcast %4 : vector<1x384xf32> to vector<32x384xf32>
    %6 = arith.addf %3, %5 : vector<32x384xf32>
    %7 = arith.truncf %6 : vector<32x384xf32> to vector<32x384xbf16>
    %8 = tpu.iota {dimensions = array<i32: 0>} : vector<16x16xi32>
    %9 = tpu.iota {dimensions = array<i32: 1>} : vector<16x16xi32>
    %10 = arith.cmpi sgt, %9, %8 : vector<16x16xi32>
    %11 = vector.extract_strided_slice %7 {offsets = [0, 0], sizes = [16, 32], strides = [1, 1]} : vector<32x384xbf16> to vector<16x32xbf16>
    %12 = vector.extract_strided_slice %7 {offsets = [0, 128], sizes = [16, 32], strides = [1, 1]} : vector<32x384xbf16> to vector<16x32xbf16>
    %13 = vector.extract_strided_slice %7 {offsets = [0, 256], sizes = [16, 32], strides = [1, 1]} : vector<32x384xbf16> to vector<16x32xbf16>
    %cst_6 = arith.constant dense<0.000000e+00> : vector<16x16xf32>
    %14 = tpu.matmul %11, %12, %cst_6 {dimension_numbers = #tpu.dot_dimension_numbers<[1], [1], [0], [0], [0, 0, 1, 0], [], []>} : vector<16x32xbf16>, vector<16x32xbf16>, vector<16x16xf32> -> vector<16x16xf32>
    %cst_7 = arith.constant -1.000000e+30 : f32
    %15 = vector.broadcast %cst_7 : f32 to vector<16x16xf32>
    %16 = arith.select %10, %15, %14 : vector<16x16xi1>, vector<16x16xf32>
    %cst_8 = arith.constant dense<0xFF800000> : vector<16xf32>
    %17 = vector.multi_reduction <maximumf>, %16, %cst_8 [1] : vector<16x16xf32> to vector<16xf32>
    %18 = vector.shape_cast %17 : vector<16xf32> to vector<16x1xf32>
    %19 = vector.broadcast %18 : vector<16x1xf32> to vector<16x16xf32>
    %20 = arith.subf %16, %19 : vector<16x16xf32>
    %21 = math.exp %20 : vector<16x16xf32>
    %cst_9 = arith.constant dense<0.000000e+00> : vector<16xf32>
    %22 = vector.multi_reduction <add>, %21, %cst_9 [1] : vector<16x16xf32> to vector<16xf32>
    %23 = vector.shape_cast %22 : vector<16xf32> to vector<16x1xf32>
    %24 = arith.truncf %21 : vector<16x16xf32> to vector<16x16xbf16>
    %cst_10 = arith.constant dense<0.000000e+00> : vector<16x32xf32>
    %25 = tpu.matmul %24, %13, %cst_10 {dimension_numbers = #tpu.dot_dimension_numbers<[1], [0], [0], [1], [0, 0, 1, 1], [], []>} : vector<16x16xbf16>, vector<16x32xbf16>, vector<16x32xf32> -> vector<16x32xf32>
    %26 = tpu.reciprocal %23 {approx = true} : vector<16x1xf32> -> vector<16x1xf32>
    %27 = vector.broadcast %26 : vector<16x1xf32> to vector<16x32xf32>
    %28 = arith.mulf %25, %27 : vector<16x32xf32>
    %29 = arith.truncf %28 : vector<16x32xf32> to vector<16x32xbf16>
    %c0_11 = arith.constant 0 : index
    %c0_12 = arith.constant 0 : index
    %30 = vector.load %arg7[%c0_11, %c0_12] : memref<32x128xbf16, #tpu.memory_space<vmem>>, vector<16x32xbf16>
    tpu.vector_store %arg7[%c0_11, %c0_12], %29 {strides = array<i32>} : memref<32x128xbf16, #tpu.memory_space<vmem>>, vector<16x32xbf16>,
    %31 = vector.extract_strided_slice %7 {offsets = [0, 32], sizes = [16, 32], strides = [1, 1]} : vector<32x384xbf16> to vector<16x32xbf16>
    %32 = vector.extract_strided_slice %7 {offsets = [0, 160], sizes = [16, 32], strides = [1, 1]} : vector<32x384xbf16> to vector<16x32xbf16>
    %33 = vector.extract_strided_slice %7 {offsets = [0, 288], sizes = [16, 32], strides = [1, 1]} : vector<32x384xbf16> to vector<16x32xbf16>
    %cst_13 = arith.constant dense<0.000000e+00> : vector<16x16xf32>
    %34 = tpu.matmul %31, %32, %cst_13 {dimension_numbers = #tpu.dot_dimension_numbers<[1], [1], [0], [0], [0, 0, 1, 0], [], []>} : vector<16x32xbf16>, vector<16x32xbf16>, vector<16x16xf32> -> vector<16x16xf32>
    %cst_14 = arith.constant -1.000000e+30 : f32
    %35 = vector.broadcast %cst_14 : f32 to vector<16x16xf32>
    %36 = arith.select %10, %35, %34 : vector<16x16xi1>, vector<16x16xf32>
    %cst_15 = arith.constant dense<0xFF800000> : vector<16xf32>
    %37 = vector.multi_reduction <maximumf>, %36, %cst_15 [1] : vector<16x16xf32> to vector<16xf32>
    %38 = vector.shape_cast %37 : vector<16xf32> to vector<16x1xf32>
    %39 = vector.broadcast %38 : vector<16x1xf32> to vector<16x16xf32>
    %40 = arith.subf %36, %39 : vector<16x16xf32>
    %41 = math.exp %40 : vector<16x16xf32>
    %cst_16 = arith.constant dense<0.000000e+00> : vector<16xf32>
    %42 = vector.multi_reduction <add>, %41, %cst_16 [1] : vector<16x16xf32> to vector<16xf32>
    %43 = vector.shape_cast %42 : vector<16xf32> to vector<16x1xf32>
    %44 = arith.truncf %41 : vector<16x16xf32> to vector<16x16xbf16>
    %cst_17 = arith.constant dense<0.000000e+00> : vector<16x32xf32>
    %45 = tpu.matmul %44, %33, %cst_17 {dimension_numbers = #tpu.dot_dimension_numbers<[1], [0], [0], [1], [0, 0, 1, 1], [], []>} : vector<16x16xbf16>, vector<16x32xbf16>, vector<16x32xf32> -> vector<16x32xf32>
    %46 = tpu.reciprocal %43 {approx = true} : vector<16x1xf32> -> vector<16x1xf32>
    %47 = vector.broadcast %46 : vector<16x1xf32> to vector<16x32xf32>
    %48 = arith.mulf %45, %47 : vector<16x32xf32>
    %49 = arith.truncf %48 : vector<16x32xf32> to vector<16x32xbf16>
    %c0_18 = arith.constant 0 : index
    %c32 = arith.constant 32 : index
    %50 = vector.load %arg7[%c0_18, %c32] : memref<32x128xbf16, #tpu.memory_space<vmem>>, vector<16x32xbf16>
    tpu.vector_store %arg7[%c0_18, %c32], %49 {strides = array<i32>} : memref<32x128xbf16, #tpu.memory_space<vmem>>, vector<16x32xbf16>,
    %51 = vector.extract_strided_slice %7 {offsets = [0, 64], sizes = [16, 32], strides = [1, 1]} : vector<32x384xbf16> to vector<16x32xbf16>
    %52 = vector.extract_strided_slice %7 {offsets = [0, 192], sizes = [16, 32], strides = [1, 1]} : vector<32x384xbf16> to vector<16x32xbf16>
    %53 = vector.extract_strided_slice %7 {offsets = [0, 320], sizes = [16, 32], strides = [1, 1]} : vector<32x384xbf16> to vector<16x32xbf16>
    %cst_19 = arith.constant dense<0.000000e+00> : vector<16x16xf32>
    %54 = tpu.matmul %51, %52, %cst_19 {dimension_numbers = #tpu.dot_dimension_numbers<[1], [1], [0], [0], [0, 0, 1, 0], [], []>} : vector<16x32xbf16>, vector<16x32xbf16>, vector<16x16xf32> -> vector<16x16xf32>
    %cst_20 = arith.constant -1.000000e+30 : f32
    %55 = vector.broadcast %cst_20 : f32 to vector<16x16xf32>
    %56 = arith.select %10, %55, %54 : vector<16x16xi1>, vector<16x16xf32>
    %cst_21 = arith.constant dense<0xFF800000> : vector<16xf32>
    %57 = vector.multi_reduction <maximumf>, %56, %cst_21 [1] : vector<16x16xf32> to vector<16xf32>
    %58 = vector.shape_cast %57 : vector<16xf32> to vector<16x1xf32>
    %59 = vector.broadcast %58 : vector<16x1xf32> to vector<16x16xf32>
    %60 = arith.subf %56, %59 : vector<16x16xf32>
    %61 = math.exp %60 : vector<16x16xf32>
    %cst_22 = arith.constant dense<0.000000e+00> : vector<16xf32>
    %62 = vector.multi_reduction <add>, %61, %cst_22 [1] : vector<16x16xf32> to vector<16xf32>
    %63 = vector.shape_cast %62 : vector<16xf32> to vector<16x1xf32>
    %64 = arith.truncf %61 : vector<16x16xf32> to vector<16x16xbf16>
    %cst_23 = arith.constant dense<0.000000e+00> : vector<16x32xf32>
    %65 = tpu.matmul %64, %53, %cst_23 {dimension_numbers = #tpu.dot_dimension_numbers<[1], [0], [0], [1], [0, 0, 1, 1], [], []>} : vector<16x16xbf16>, vector<16x32xbf16>, vector<16x32xf32> -> vector<16x32xf32>
    %66 = tpu.reciprocal %63 {approx = true} : vector<16x1xf32> -> vector<16x1xf32>
    %67 = vector.broadcast %66 : vector<16x1xf32> to vector<16x32xf32>
    %68 = arith.mulf %65, %67 : vector<16x32xf32>
    %69 = arith.truncf %68 : vector<16x32xf32> to vector<16x32xbf16>
    %c0_24 = arith.constant 0 : index
    %c64 = arith.constant 64 : index
    %70 = vector.load %arg7[%c0_24, %c64] : memref<32x128xbf16, #tpu.memory_space<vmem>>, vector<16x32xbf16>
    tpu.vector_store %arg7[%c0_24, %c64], %69 {strides = array<i32>} : memref<32x128xbf16, #tpu.memory_space<vmem>>, vector<16x32xbf16>,
    %71 = vector.extract_strided_slice %7 {offsets = [0, 96], sizes = [16, 32], strides = [1, 1]} : vector<32x384xbf16> to vector<16x32xbf16>
    %72 = vector.extract_strided_slice %7 {offsets = [0, 224], sizes = [16, 32], strides = [1, 1]} : vector<32x384xbf16> to vector<16x32xbf16>
    %73 = vector.extract_strided_slice %7 {offsets = [0, 352], sizes = [16, 32], strides = [1, 1]} : vector<32x384xbf16> to vector<16x32xbf16>
    %cst_25 = arith.constant dense<0.000000e+00> : vector<16x16xf32>
    %74 = tpu.matmul %71, %72, %cst_25 {dimension_numbers = #tpu.dot_dimension_numbers<[1], [1], [0], [0], [0, 0, 1, 0], [], []>} : vector<16x32xbf16>, vector<16x32xbf16>, vector<16x16xf32> -> vector<16x16xf32>
    %cst_26 = arith.constant -1.000000e+30 : f32
    %75 = vector.broadcast %cst_26 : f32 to vector<16x16xf32>
    %76 = arith.select %10, %75, %74 : vector<16x16xi1>, vector<16x16xf32>
    %cst_27 = arith.constant dense<0xFF800000> : vector<16xf32>
    %77 = vector.multi_reduction <maximumf>, %76, %cst_27 [1] : vector<16x16xf32> to vector<16xf32>
    %78 = vector.shape_cast %77 : vector<16xf32> to vector<16x1xf32>
    %79 = vector.broadcast %78 : vector<16x1xf32> to vector<16x16xf32>
    %80 = arith.subf %76, %79 : vector<16x16xf32>
    %81 = math.exp %80 : vector<16x16xf32>
    %cst_28 = arith.constant dense<0.000000e+00> : vector<16xf32>
    %82 = vector.multi_reduction <add>, %81, %cst_28 [1] : vector<16x16xf32> to vector<16xf32>
    %83 = vector.shape_cast %82 : vector<16xf32> to vector<16x1xf32>
    %84 = arith.truncf %81 : vector<16x16xf32> to vector<16x16xbf16>
    %cst_29 = arith.constant dense<0.000000e+00> : vector<16x32xf32>
    %85 = tpu.matmul %84, %73, %cst_29 {dimension_numbers = #tpu.dot_dimension_numbers<[1], [0], [0], [1], [0, 0, 1, 1], [], []>} : vector<16x16xbf16>, vector<16x32xbf16>, vector<16x32xf32> -> vector<16x32xf32>
    %86 = tpu.reciprocal %83 {approx = true} : vector<16x1xf32> -> vector<16x1xf32>
    %87 = vector.broadcast %86 : vector<16x1xf32> to vector<16x32xf32>
    %88 = arith.mulf %85, %87 : vector<16x32xf32>
    %89 = arith.truncf %88 : vector<16x32xf32> to vector<16x32xbf16>
    %c0_30 = arith.constant 0 : index
    %c96 = arith.constant 96 : index
    %90 = vector.load %arg7[%c0_30, %c96] : memref<32x128xbf16, #tpu.memory_space<vmem>>, vector<16x32xbf16>
    tpu.vector_store %arg7[%c0_30, %c96], %89 {strides = array<i32>} : memref<32x128xbf16, #tpu.memory_space<vmem>>, vector<16x32xbf16>,
    %91 = vector.extract_strided_slice %7 {offsets = [16, 0], sizes = [16, 32], strides = [1, 1]} : vector<32x384xbf16> to vector<16x32xbf16>
    %92 = vector.extract_strided_slice %7 {offsets = [16, 128], sizes = [16, 32], strides = [1, 1]} : vector<32x384xbf16> to vector<16x32xbf16>
    %93 = vector.extract_strided_slice %7 {offsets = [16, 256], sizes = [16, 32], strides = [1, 1]} : vector<32x384xbf16> to vector<16x32xbf16>
    %cst_31 = arith.constant dense<0.000000e+00> : vector<16x16xf32>
    %94 = tpu.matmul %91, %92, %cst_31 {dimension_numbers = #tpu.dot_dimension_numbers<[1], [1], [0], [0], [0, 0, 1, 0], [], []>} : vector<16x32xbf16>, vector<16x32xbf16>, vector<16x16xf32> -> vector<16x16xf32>
    %cst_32 = arith.constant -1.000000e+30 : f32
    %95 = vector.broadcast %cst_32 : f32 to vector<16x16xf32>
    %96 = arith.select %10, %95, %94 : vector<16x16xi1>, vector<16x16xf32>
    %cst_33 = arith.constant dense<0xFF800000> : vector<16xf32>
    %97 = vector.multi_reduction <maximumf>, %96, %cst_33 [1] : vector<16x16xf32> to vector<16xf32>
    %98 = vector.shape_cast %97 : vector<16xf32> to vector<16x1xf32>
    %99 = vector.broadcast %98 : vector<16x1xf32> to vector<16x16xf32>
    %100 = arith.subf %96, %99 : vector<16x16xf32>
    %101 = math.exp %100 : vector<16x16xf32>
    %cst_34 = arith.constant dense<0.000000e+00> : vector<16xf32>
    %102 = vector.multi_reduction <add>, %101, %cst_34 [1] : vector<16x16xf32> to vector<16xf32>
    %103 = vector.shape_cast %102 : vector<16xf32> to vector<16x1xf32>
    %104 = arith.truncf %101 : vector<16x16xf32> to vector<16x16xbf16>
    %cst_35 = arith.constant dense<0.000000e+00> : vector<16x32xf32>
    %105 = tpu.matmul %104, %93, %cst_35 {dimension_numbers = #tpu.dot_dimension_numbers<[1], [0], [0], [1], [0, 0, 1, 1], [], []>} : vector<16x16xbf16>, vector<16x32xbf16>, vector<16x32xf32> -> vector<16x32xf32>
    %106 = tpu.reciprocal %103 {approx = true} : vector<16x1xf32> -> vector<16x1xf32>
    %107 = vector.broadcast %106 : vector<16x1xf32> to vector<16x32xf32>
    %108 = arith.mulf %105, %107 : vector<16x32xf32>
    %109 = arith.truncf %108 : vector<16x32xf32> to vector<16x32xbf16>
    %c16 = arith.constant 16 : index
    %c0_36 = arith.constant 0 : index
    %110 = vector.load %arg7[%c16, %c0_36] : memref<32x128xbf16, #tpu.memory_space<vmem>>, vector<16x32xbf16>
    tpu.vector_store %arg7[%c16, %c0_36], %109 {strides = array<i32>} : memref<32x128xbf16, #tpu.memory_space<vmem>>, vector<16x32xbf16>,
    %111 = vector.extract_strided_slice %7 {offsets = [16, 32], sizes = [16, 32], strides = [1, 1]} : vector<32x384xbf16> to vector<16x32xbf16>
    %112 = vector.extract_strided_slice %7 {offsets = [16, 160], sizes = [16, 32], strides = [1, 1]} : vector<32x384xbf16> to vector<16x32xbf16>
    %113 = vector.extract_strided_slice %7 {offsets = [16, 288], sizes = [16, 32], strides = [1, 1]} : vector<32x384xbf16> to vector<16x32xbf16>
    %cst_37 = arith.constant dense<0.000000e+00> : vector<16x16xf32>
    %114 = tpu.matmul %111, %112, %cst_37 {dimension_numbers = #tpu.dot_dimension_numbers<[1], [1], [0], [0], [0, 0, 1, 0], [], []>} : vector<16x32xbf16>, vector<16x32xbf16>, vector<16x16xf32> -> vector<16x16xf32>
    %cst_38 = arith.constant -1.000000e+30 : f32
    %115 = vector.broadcast %cst_38 : f32 to vector<16x16xf32>
    %116 = arith.select %10, %115, %114 : vector<16x16xi1>, vector<16x16xf32>
    %cst_39 = arith.constant dense<0xFF800000> : vector<16xf32>
    %117 = vector.multi_reduction <maximumf>, %116, %cst_39 [1] : vector<16x16xf32> to vector<16xf32>
    %118 = vector.shape_cast %117 : vector<16xf32> to vector<16x1xf32>
    %119 = vector.broadcast %118 : vector<16x1xf32> to vector<16x16xf32>
    %120 = arith.subf %116, %119 : vector<16x16xf32>
    %121 = math.exp %120 : vector<16x16xf32>
    %cst_40 = arith.constant dense<0.000000e+00> : vector<16xf32>
    %122 = vector.multi_reduction <add>, %121, %cst_40 [1] : vector<16x16xf32> to vector<16xf32>
    %123 = vector.shape_cast %122 : vector<16xf32> to vector<16x1xf32>
    %124 = arith.truncf %121 : vector<16x16xf32> to vector<16x16xbf16>
    %cst_41 = arith.constant dense<0.000000e+00> : vector<16x32xf32>
    %125 = tpu.matmul %124, %113, %cst_41 {dimension_numbers = #tpu.dot_dimension_numbers<[1], [0], [0], [1], [0, 0, 1, 1], [], []>} : vector<16x16xbf16>, vector<16x32xbf16>, vector<16x32xf32> -> vector<16x32xf32>
    %126 = tpu.reciprocal %123 {approx = true} : vector<16x1xf32> -> vector<16x1xf32>
    %127 = vector.broadcast %126 : vector<16x1xf32> to vector<16x32xf32>
    %128 = arith.mulf %125, %127 : vector<16x32xf32>
    %129 = arith.truncf %128 : vector<16x32xf32> to vector<16x32xbf16>
    %c16_42 = arith.constant 16 : index
    %c32_43 = arith.constant 32 : index
    %130 = vector.load %arg7[%c16_42, %c32_43] : memref<32x128xbf16, #tpu.memory_space<vmem>>, vector<16x32xbf16>
    tpu.vector_store %arg7[%c16_42, %c32_43], %129 {strides = array<i32>} : memref<32x128xbf16, #tpu.memory_space<vmem>>, vector<16x32xbf16>,
    %131 = vector.extract_strided_slice %7 {offsets = [16, 64], sizes = [16, 32], strides = [1, 1]} : vector<32x384xbf16> to vector<16x32xbf16>
    %132 = vector.extract_strided_slice %7 {offsets = [16, 192], sizes = [16, 32], strides = [1, 1]} : vector<32x384xbf16> to vector<16x32xbf16>
    %133 = vector.extract_strided_slice %7 {offsets = [16, 320], sizes = [16, 32], strides = [1, 1]} : vector<32x384xbf16> to vector<16x32xbf16>
    %cst_44 = arith.constant dense<0.000000e+00> : vector<16x16xf32>
    %134 = tpu.matmul %131, %132, %cst_44 {dimension_numbers = #tpu.dot_dimension_numbers<[1], [1], [0], [0], [0, 0, 1, 0], [], []>} : vector<16x32xbf16>, vector<16x32xbf16>, vector<16x16xf32> -> vector<16x16xf32>
    %cst_45 = arith.constant -1.000000e+30 : f32
    %135 = vector.broadcast %cst_45 : f32 to vector<16x16xf32>
    %136 = arith.select %10, %135, %134 : vector<16x16xi1>, vector<16x16xf32>
    %cst_46 = arith.constant dense<0xFF800000> : vector<16xf32>
    %137 = vector.multi_reduction <maximumf>, %136, %cst_46 [1] : vector<16x16xf32> to vector<16xf32>
    %138 = vector.shape_cast %137 : vector<16xf32> to vector<16x1xf32>
    %139 = vector.broadcast %138 : vector<16x1xf32> to vector<16x16xf32>
    %140 = arith.subf %136, %139 : vector<16x16xf32>
    %141 = math.exp %140 : vector<16x16xf32>
    %cst_47 = arith.constant dense<0.000000e+00> : vector<16xf32>
    %142 = vector.multi_reduction <add>, %141, %cst_47 [1] : vector<16x16xf32> to vector<16xf32>
    %143 = vector.shape_cast %142 : vector<16xf32> to vector<16x1xf32>
    %144 = arith.truncf %141 : vector<16x16xf32> to vector<16x16xbf16>
    %cst_48 = arith.constant dense<0.000000e+00> : vector<16x32xf32>
    %145 = tpu.matmul %144, %133, %cst_48 {dimension_numbers = #tpu.dot_dimension_numbers<[1], [0], [0], [1], [0, 0, 1, 1], [], []>} : vector<16x16xbf16>, vector<16x32xbf16>, vector<16x32xf32> -> vector<16x32xf32>
    %146 = tpu.reciprocal %143 {approx = true} : vector<16x1xf32> -> vector<16x1xf32>
    %147 = vector.broadcast %146 : vector<16x1xf32> to vector<16x32xf32>
    %148 = arith.mulf %145, %147 : vector<16x32xf32>
    %149 = arith.truncf %148 : vector<16x32xf32> to vector<16x32xbf16>
    %c16_49 = arith.constant 16 : index
    %c64_50 = arith.constant 64 : index
    %150 = vector.load %arg7[%c16_49, %c64_50] : memref<32x128xbf16, #tpu.memory_space<vmem>>, vector<16x32xbf16>
    tpu.vector_store %arg7[%c16_49, %c64_50], %149 {strides = array<i32>} : memref<32x128xbf16, #tpu.memory_space<vmem>>, vector<16x32xbf16>,
    %151 = vector.extract_strided_slice %7 {offsets = [16, 96], sizes = [16, 32], strides = [1, 1]} : vector<32x384xbf16> to vector<16x32xbf16>
    %152 = vector.extract_strided_slice %7 {offsets = [16, 224], sizes = [16, 32], strides = [1, 1]} : vector<32x384xbf16> to vector<16x32xbf16>
    %153 = vector.extract_strided_slice %7 {offsets = [16, 352], sizes = [16, 32], strides = [1, 1]} : vector<32x384xbf16> to vector<16x32xbf16>
    %cst_51 = arith.constant dense<0.000000e+00> : vector<16x16xf32>
    %154 = tpu.matmul %151, %152, %cst_51 {dimension_numbers = #tpu.dot_dimension_numbers<[1], [1], [0], [0], [0, 0, 1, 0], [], []>} : vector<16x32xbf16>, vector<16x32xbf16>, vector<16x16xf32> -> vector<16x16xf32>
    %cst_52 = arith.constant -1.000000e+30 : f32
    %155 = vector.broadcast %cst_52 : f32 to vector<16x16xf32>
    %156 = arith.select %10, %155, %154 : vector<16x16xi1>, vector<16x16xf32>
    %cst_53 = arith.constant dense<0xFF800000> : vector<16xf32>
    %157 = vector.multi_reduction <maximumf>, %156, %cst_53 [1] : vector<16x16xf32> to vector<16xf32>
    %158 = vector.shape_cast %157 : vector<16xf32> to vector<16x1xf32>
    %159 = vector.broadcast %158 : vector<16x1xf32> to vector<16x16xf32>
    %160 = arith.subf %156, %159 : vector<16x16xf32>
    %161 = math.exp %160 : vector<16x16xf32>
    %cst_54 = arith.constant dense<0.000000e+00> : vector<16xf32>
    %162 = vector.multi_reduction <add>, %161, %cst_54 [1] : vector<16x16xf32> to vector<16xf32>
    %163 = vector.shape_cast %162 : vector<16xf32> to vector<16x1xf32>
    %164 = arith.truncf %161 : vector<16x16xf32> to vector<16x16xbf16>
    %cst_55 = arith.constant dense<0.000000e+00> : vector<16x32xf32>
    %165 = tpu.matmul %164, %153, %cst_55 {dimension_numbers = #tpu.dot_dimension_numbers<[1], [0], [0], [1], [0, 0, 1, 1], [], []>} : vector<16x16xbf16>, vector<16x32xbf16>, vector<16x32xf32> -> vector<16x32xf32>
    %166 = tpu.reciprocal %163 {approx = true} : vector<16x1xf32> -> vector<16x1xf32>
    %167 = vector.broadcast %166 : vector<16x1xf32> to vector<16x32xf32>
    %168 = arith.mulf %165, %167 : vector<16x32xf32>
    %169 = arith.truncf %168 : vector<16x32xf32> to vector<16x32xbf16>
    %c16_56 = arith.constant 16 : index
    %c96_57 = arith.constant 96 : index
    %170 = vector.load %arg7[%c16_56, %c96_57] : memref<32x128xbf16, #tpu.memory_space<vmem>>, vector<16x32xbf16>
    tpu.vector_store %arg7[%c16_56, %c96_57], %169 {strides = array<i32>} : memref<32x128xbf16, #tpu.memory_space<vmem>>, vector<16x32xbf16>,
    %c0_58 = arith.constant 0 : index
    %c0_59 = arith.constant 0 : index
    %171 = vector.load %arg7[%c0_58, %c0_59] : memref<32x128xbf16, #tpu.memory_space<vmem>>, vector<32x128xbf16>
    %c0_60 = arith.constant 0 : index
    %c0_61 = arith.constant 0 : index
    %172 = vector.load %arg4[%c0_60, %c0_61] : memref<128x128xbf16, #tpu.memory_space<vmem>>, vector<128x128xbf16>
    %cst_62 = arith.constant dense<0.000000e+00> : vector<32x128xf32>
    %173 = tpu.matmul %171, %172, %cst_62 {dimension_numbers = #tpu.dot_dimension_numbers<[1], [0], [0], [1], [0, 0, 1, 1], [], []>} : vector<32x128xbf16>, vector<128x128xbf16>, vector<32x128xf32> -> vector<32x128xf32>
    %c0_63 = arith.constant 0 : index
    %c0_64 = arith.constant 0 : index
    %174 = vector.load %arg5[%c0_63, %c0_64] : memref<1x128xf32, #tpu.memory_space<vmem>>, vector<1x128xf32>
    %175 = vector.broadcast %174 : vector<1x128xf32> to vector<32x128xf32>
    %176 = arith.addf %173, %175 : vector<32x128xf32>
    %177 = vector.shape_cast %176 : vector<32x128xf32> to vector<2x16x128xf32>
    %c0_65 = arith.constant 0 : index
    %c0_66 = arith.constant 0 : index
    %c0_67 = arith.constant 0 : index
    %178 = vector.load %arg6[%c0_65, %c0_66, %c0_67] : memref<2x16x128xf32, #tpu.memory_space<vmem>>, vector<2x16x128xf32>
    tpu.vector_store %arg6[%c0_65, %c0_66, %c0_67], %177 {strides = array<i32>} : memref<2x16x128xf32, #tpu.memory_space<vmem>>, vector<2x16x128xf32>,
    return
  }
  func.func @transform_0(%arg0: i32) -> (i32, i32, i32) {
    %c0_i32 = arith.constant 0 : i32
    %c0_i32_0 = arith.constant 0 : i32
    %c0_i32_1 = arith.constant 0 : i32
    return %arg0, %c0_i32, %c0_i32_0 : i32, i32, i32
  }
  func.func @transform_1(%arg0: i32) -> (i32, i32) {
    %c0_i32 = arith.constant 0 : i32
    %c0_i32_0 = arith.constant 0 : i32
    %c0_i32_1 = arith.constant 0 : i32
    return %c0_i32, %c0_i32_0 : i32, i32
  }
  func.func @transform_2(%arg0: i32) -> (i32, i32) {
    %c0_i32 = arith.constant 0 : i32
    %c0_i32_0 = arith.constant 0 : i32
    %c0_i32_1 = arith.constant 0 : i32
    return %c0_i32, %c0_i32_0 : i32, i32
  }
  func.func @transform_3(%arg0: i32) -> (i32, i32) {
    %c0_i32 = arith.constant 0 : i32
    %c0_i32_0 = arith.constant 0 : i32
    %c0_i32_1 = arith.constant 0 : i32
    return %c0_i32, %c0_i32_0 : i32, i32
  }
  func.func @transform_4(%arg0: i32) -> (i32, i32) {
    %c0_i32 = arith.constant 0 : i32
    %c0_i32_0 = arith.constant 0 : i32
    %c0_i32_1 = arith.constant 0 : i32
    return %c0_i32, %c0_i32_0 : i32, i32
  }
  func.func @transform_5(%arg0: i32) -> (i32, i32, i32) {
    %c0_i32 = arith.constant 0 : i32
    %c0_i32_0 = arith.constant 0 : i32
    %c0_i32_1 = arith.constant 0 : i32
    return %arg0, %c0_i32, %c0_i32_0 : i32, i32, i32
  }
}

</mosaic_0001>

<bundles_post_ra>
// kernel: tpu_custom_call.1
= control target key start
LH: loop header
LB: loop body
LE: loop exit
PB: predicated region body
PF: predicated region fallthrough
CT: control target
= control target key end

     0   :  { %10 = vsyncpa [#allocation4], 0  ;;  %s2471_s0 = inlined_call_operand.hbm [shape: bf16[4,16,128], index: 0, kind: input, shape index: {}]   ;;  %s2472_s1 = inlined_call_operand.hbm [shape: bf16[128,384], index: 1, kind: input, shape index: {}]   ;;  %s2473_s2 = inlined_call_operand.hbm [shape: f32[1,384], index: 2, kind: input, shape index: {}]   ;;  %s2474_s3 = inlined_call_operand.hbm [shape: bf16[128,128], index: 3, kind: input, shape index: {}]   ;;  %s2475_s4 = inlined_call_operand.vmem [shape: f32[1,128], index: 4, kind: input, shape index: {}]   ;;  %s2476_s5 = inlined_call_operand.hbm [shape: f32[4,16,128], index: 5, kind: output, shape index: {}]  }
   0x1   :  { %12 = vsyncpa [#allocation4 + $0x1], 0 }
   0x2   :  { %13 = vsyncpa [#allocation7], 0 }
   0x3   :  { %14 = vsyncpa [#allocation10], 0 }
   0x4   :  { %15 = vsyncpa [#allocation5], 0 }
   0x5   :  { %17 = vsyncpa [#allocation5 + $0x1], 0  ;;  %s2042_s18 = smov 0   ;;  %s2044_s19 = smov 0  }
   0x6   :  { %s2046_s20 = smov 0   ;;  %s2048_s21 = smov 0  }
   0x7 LB: > { %s2063_s22 = sadd.s32 4294967295, %s1998_s21   ;;  %s1431_s23 = sadd.s32 4294967294, %s1998_s21   ;;  %s1998_s21 = sphi %s2048_s21, %s2493_s21   ;;  %s1994_s20 = sphi %s2046_s20, %s2492_s20   ;;  %s1990_s19 = sphi %s2044_s19, %s2491_s19   ;;  %s1986_s18 = sphi %s2042_s18, %s2490_s18  }
   0x8   : > { %p43_p0 = scmp.ne.s32.totalorder %s1990_s19, %s1986_s18  ;;  %p44_p1 = scmp.eq.s32.totalorder %s2063_s22, 0 }
   0x9   : > { %p151_p2 = scmp.eq.s32.totalorder %s2063_s22, 1  ;;  %p157_p3 = scmp.eq.s32.totalorder %s1431_s23, 1 }
   0xa   : > { %p2072_p4 = por %p44_p1, %p43_p0  ;;  %p1432_p5 = scmp.ge.s32.totalorder %s1998_s21, 1 }
   0xb   : > { %p2077_p6 = por %p157_p3, %p43_p0  ;;  %p164_p7 = scmp.lt.s32.totalorder %s1998_s21, 3 }
   0xc   : > { %s175_s28 = sshll.u32 %s2472_s1, 4  ;;  %s2000_s30 = smov [#allocation6]   ;;  %s176_s28 = int_to_ptr.hbm [resolvable:$true] %s175_s28 }
   0xd   : > { %p2085_p8 = pnand %p1432_p5, %p164_p7  ;;  %s177_s6 = sshll.u32 %s2000_s30, 4  ;;  %s178_s6 = int_to_ptr.vmem [resolvable:$true] %s177_s6 }
   0xe   : > { %s190_s10 = sshll.u32 %s2473_s2, 4  ;;  %s2001_s11 = smov 192   ;;  %s191_s10 = int_to_ptr.hbm [resolvable:$true] %s190_s10 }
   0xf   : > { %p1669_p9 = pneg %p2085_p8  ;;  %s2002_s12 = smov 12  }
  0x10   : > { %s2003_s13 = smov [#allocation8]   ;;  %s201_s17 = sshll.u32 %s2474_s3, 4  ;;  %s202_s17 = int_to_ptr.hbm [resolvable:$true] %s201_s17 }
  0x11   : > { %p2093_p10 = pnand %p1669_p9, %p44_p1  ;;  %s192_s14 = sshll.u32 %s2003_s13, 4  ;;  %s193_s14 = int_to_ptr.vmem [resolvable:$true] %s192_s14 }
  0x12   : > { %s2004_s23 = smov [#allocation9]   ;;  %s2477_s27 = smov 64  }
  0x13   : > { %1672 = dma.hbm_to_vmem [thread:$0]  (!%p2093_p10), %s176_s28, 3072, %s178_s6, [#allocation7], %s2001_s11, %s2001_s11, %s2002_s12  }
  0x14   : > { %1675 = dma.hbm_to_vmem [thread:$0]  (!%p2093_p10), %s191_s10, 48, %s193_s14, [#allocation7]  }
  0x15   : > { %s203_s26 = sshll.u32 %s2004_s23, 4  ;;  %s2006_s28 = smov 4   ;;  %s204_s26 = int_to_ptr.vmem [resolvable:$true] %s203_s26 }
  0x16   : > { %1678 = dma.hbm_to_vmem [thread:$0]  (!%p2093_p10), %s202_s17, 1024, %s204_s26, [#allocation10], %s2477_s27, %s2477_s27, %s2006_s28  }
  0x17   : > { %s2114_s30 = sadd.s32 1, %s1998_s21   ;;  %s30_s8 = sadd.s32 1, %s1994_s20 }
  0x18   : > { %s27_s6 = ssub.s32 %s1998_s21, %s2114_s30  ;;  %p37_p13 = scmp.ne.s32.totalorder %s1994_s20, %s1990_s19 }
  0x19   : > { %p28_p12 = scmp.eq.s32.totalorder %s27_s6, 0  ;;  %p38_p0 = scmp.eq.s32.totalorder %s1998_s21, 0 }
  0x1a   : > { %p2127_p3 = por %p151_p2, %p37_p13  ;;  %p1690_p5 = scmp.lt.s32.totalorder %s1998_s21, 2 }
  0x1b   : > { %s2123_s9 = scalar_select %p28_p12, %s1994_s20, %s30_s8  }
  0x1c   : > { %s220_s7 = sand.u32 1, %s1994_s20   ;;  %s1614_s11 = sshll.u32 %s1998_s21, 4 }
  0x1d   : > { %p39_p7 = por %p38_p0, %p37_p13  ;;  %s1437_s12 = sshll.u32 %s220_s7, 4 }
  0x1e   : > { %s230_s15 = scalar_lea.hbm %s2471_s0, %s1614_s11  ;;  %s224_s17 = scalar_lea.vmem [#allocation3], %s1437_s12 }
  0x1f   : > { %s231_s16 = sshll.u32 %s230_s15, 4  ;;  %s233_s23 = sshll.u32 %s224_s17, 4  ;;  %s232_s16 = int_to_ptr.hbm [resolvable:$true] %s231_s16  ;;  %s234_s23 = int_to_ptr.vmem [resolvable:$true] %s233_s23 }
  0x20   : > { %p2137_p9 = pnand %p1690_p5, %p39_p7  ;;  %s221_s6 = scalar_lea.sflag [#allocation4], %s220_s7 }
  0x21   : > { %s1894_s8 = sshra.s32 %s232_s16, 4  ;;  %s1901_s12 = scalar_lea.hbm %s2471_s0, 32  ;;  %s1895_s8 = int_to_ptr.hbm [resolvable:$true] %s1894_s8 }
  0x22   : > { %s1896_s27 = scalar_lea.hbm %s1895_s8, 16  ;;  %p1898_p10 = pneg %p2137_p9 }
  0x23   : > { %p1897_p2 = scmp.ne.s32.totalorder %s1895_s8, %s1896_s27  ;;  %p1902_p0 = scmp.lt.s32.totalorder %s1895_s8, %s2471_s0 }
  0x24   : > { %p1903_p5 = scmp.lt.s32.totalorder %s1901_s12, %s1896_s27 }
  0x25   : > { %p1899_p12 = pnand %p1898_p10, %p1897_p2 }
  0x26   : > { %p1904_p7 = por %p1903_p5, %p1902_p0 }
  0x27   : > { %p1900_p13 = pneg %p1899_p12 }
  0x29   : > { %p1905_p11 = pnand %p1904_p7, %p1900_p13 }
  0x2b   : > { %1908 = shalt.err (!%p1905_p11)
}
  0x2c   : > { %s2484_s7 = smov 64   ;;  %245 = sbr.rel (%p2085_p8) target bundleno = 1399 (0x577), region = 40 }
  0x2d   : > { %1682 = dma.hbm_to_vmem [thread:$0]  (!%p2137_p9), %s232_s16, 256, %s234_s23, %s221_s6, %s2484_s7, %s2484_s7, %s2006_s28  }
  0x2e   : > { %s2157_s17 = sand.u32 (!%p2085_p8), 1, %s1990_s19  }
  0x2f   : > { %s1442_s8 = sshll.u32 (!%p2085_p8), %s2157_s17, 4  ;;  %s248_s27 = scalar_lea.sflag (!%p2085_p8), [#allocation4], %s2157_s17 }
  0x30   : > { %s2161_s11 = scalar_lea.vmem (!%p2085_p8), [#allocation3], %s1442_s8 }
  0x31   : > { %1969 = dma.done.wait (%p2072_p4), %s248_s27, 256  }
  0x32   : > { %1971 = vsyncadd (%p2072_p4), %s248_s27, 4294967040 }
  0x33   : > { %1973 = dma.done.wait (%p44_p1), [#allocation7], 3120  }
  0x34   : > { %1975 = vsyncadd (%p44_p1), [#allocation7], 4294964176 }
  0x35   : > { %1977 = dma.done.wait (%p44_p1), [#allocation10], 1024  }
  0x36   : > { %1979 = vsyncadd (%p44_p1), [#allocation10], 4294966272  ;;  %v1541_v0 = vld [vmem:[#allocation6 + $0xa8] sm:$0xf]  ;;  %v1639_v1 = vld [vmem:[#allocation6 + $0xb0] sm:$0xf0] }
  0x37   : > { %v1529_v2 = vld [vmem:[#allocation6 + $0x90] sm:$0xf]  ;;  %v1542_v3 = vor.u32 %v1639_v1, %v1541_v0  ;;  %v1636_v4 = vld [vmem:[#allocation6 + $0x98] sm:$0xf0]  ;;  %v1517_v6 = vld [vmem:[#allocation6 + $0x78] sm:$0xf] }
  0x38   : > { %v1530_v5 = vor.u32 %v1636_v4, %v1529_v2  ;;  %v1633_v7 = vld [vmem:[#allocation6 + $0x80] sm:$0xf0]  ;;  %v1505_v9 = vld [vmem:[#allocation6 + $0x60] sm:$0xf]  ;;  %v1630_v10 = vld [vmem:[#allocation6 + $0x68] sm:$0xf0] }
  0x39   : > { %481 = vmatpush.bf16.msra.mxu1 %v1542_v3  ;;  %v1518_v8 = vor.u32 %v1633_v7, %v1517_v6  ;;  %v1506_v11 = vor.u32 %v1630_v10, %v1505_v9  ;;  %v1493_v12 = vld [vmem:[#allocation6 + $0x48] sm:$0xf]  ;;  %v1627_v13 = vld [vmem:[#allocation6 + $0x50] sm:$0xf0]  ;;  %v1481_v15 = vld [vmem:[#allocation6 + $0x30] sm:$0xf] }
  0x3a   : > { %v1494_v14 = vor.u32 %v1627_v13, %v1493_v12  ;;  %v1624_v16 = vld [vmem:[#allocation6 + $0x38] sm:$0xf0]  ;;  %v1469_v18 = vld [vmem:[#allocation6 + $0x18] sm:$0xf]  ;;  %v1621_v19 = vld [vmem:[#allocation6 + $0x20] sm:$0xf0] }
  0x3b   : > { %v1482_v17 = vor.u32 %v1624_v16, %v1481_v15  ;;  %v1470_v20 = vor.u32 %v1621_v19, %v1469_v18  ;;  %v1457_v21 = vld [vmem:[#allocation6] sm:$0xf]  ;;  %v1618_v22 = vld [vmem:[#allocation6 + $0x8] sm:$0xf0]  ;;  %v1543_v24 = vld [vmem:[#allocation6 + $0xb4] sm:$0xf0] }
  0x3c   : > { %v1638_v23 = vld [vmem:[#allocation6 + $0xac] sm:$0xf]  ;;  %v1458_v25 = vor.u32 %v1618_v22, %v1457_v21  ;;  %v1635_v27 = vld [vmem:[#allocation6 + $0x94] sm:$0xf]  ;;  %v1531_v28 = vld [vmem:[#allocation6 + $0x9c] sm:$0xf0] }
  0x3d   : > { %482 = vmatpush.bf16.msra.mxu1 %v1530_v5  ;;  %v1546_v26 = vor.u32 %v1638_v23, %v1543_v24  ;;  %v2176_v29 = vld [vmem:[%s2161_s11] sm:$0xff]  ;;  %v1534_v30 = vor.u32 %v1635_v27, %v1531_v28  ;;  %v1632_v31 = vld [vmem:[#allocation6 + $0x7c] sm:$0xf]  ;;  %v1519_v32 = vld [vmem:[#allocation6 + $0x84] sm:$0xf0]  ;;  %vm561_vm0 = vcmask 261120  }
  0x3e   : > { %v1522_v33 = vor.u32 %v1632_v31, %v1519_v32  ;;  %v1629_v34 = vld [vmem:[#allocation6 + $0x64] sm:$0xf]  ;;  %v1507_v35 = vld [vmem:[#allocation6 + $0x6c] sm:$0xf0]  ;;  %v1626_v37 = vld [vmem:[#allocation6 + $0x4c] sm:$0xf] }
  0x3f   : > { %v1510_v36 = vor.u32 %v1629_v34, %v1507_v35  ;;  %v1495_v38 = vld [vmem:[#allocation6 + $0x54] sm:$0xf0]  ;;  %v1623_v40 = vld [vmem:[#allocation6 + $0x34] sm:$0xf]  ;;  %v1483_v41 = vld [vmem:[#allocation6 + $0x3c] sm:$0xf0] }
  0x40   : > { %v1498_v39 = vor.u32 %v1626_v37, %v1495_v38  ;;  %v1616_v42 = vld [vmem:[%s2161_s11 + $0x8] sm:$0xff]  ;;  %v1486_v43 = vor.u32 %v1623_v40, %v1483_v41  ;;  %v1549_v46 = vld [vmem:[#allocation6 + $0xb0] sm:$0xf]  ;;  %v1637_v50 = vld [vmem:[#allocation6 + $0xa0] sm:$0xf0]  ;;  %s2007_s24 = smov 96  }
  0x41   : > { %483 = vmatpush.bf16.msra.mxu1 %v1518_v8  ;;  %v1620_v44 = vld [vmem:[#allocation6 + $0x1c] sm:$0xf]  ;;  %v1471_v45 = vld [vmem:[#allocation6 + $0x24] sm:$0xf0]  ;;  %v1537_v48 = vld [vmem:[#allocation6 + $0x98] sm:$0xf] }
  0x42   : > { %v1640_v47 = vld [vmem:[#allocation6 + $0xb8] sm:$0xf0]  ;;  %v1474_v51 = vor.u32 %v1620_v44, %v1471_v45  ;;  %v1617_v52 = vld [vmem:[#allocation6 + $0x4] sm:$0xf]  ;;  %v1459_v53 = vld [vmem:[#allocation6 + $0xc] sm:$0xf0]  ;;  %v1538_v54 = vor.u32 %v1637_v50, %v1537_v48 }
  0x43   : > { %v1550_v49 = vor.u32 %v1640_v47, %v1549_v46  ;;  %v1525_v55 = vld [vmem:[#allocation6 + $0x80] sm:$0xf]  ;;  %v1634_v56 = vld [vmem:[#allocation6 + $0x88] sm:$0xf0]  ;;  %v1462_v57 = vor.u32 %v1617_v52, %v1459_v53  ;;  %v1513_v59 = vld [vmem:[#allocation6 + $0x68] sm:$0xf] }
  0x44   : > { %v1526_v58 = vor.u32 %v1634_v56, %v1525_v55  ;;  %v1631_v60 = vld [vmem:[#allocation6 + $0x70] sm:$0xf0]  ;;  %v1501_v62 = vld [vmem:[#allocation6 + $0x50] sm:$0xf]  ;;  %v1628_v63 = vld [vmem:[#allocation6 + $0x58] sm:$0xf0] }
  0x45   : > { %484 = vmatpush.bf16.msra.mxu1 %v1506_v11  ;;  %519 = vmatpush.bf16.msra.mxu2 %v1550_v49  ;;  %v1514_v61 = vor.u32 %v1631_v60, %v1513_v59  ;;  %v1502_v0 = vor.u32 %v1628_v63, %v1501_v62  ;;  %v1489_v1 = vld [vmem:[#allocation6 + $0x38] sm:$0xf]  ;;  %v1625_v2 = vld [vmem:[#allocation6 + $0x40] sm:$0xf0]  ;;  %v1477_v4 = vld [vmem:[#allocation6 + $0x20] sm:$0xf]  ;;  %v546_v62 = vlaneseq }
  0x46   : > { %v1490_v3 = vor.u32 %v1625_v2, %v1489_v1  ;;  %v1622_v5 = vld [vmem:[#allocation6 + $0x28] sm:$0xf0]  ;;  %v1465_v7 = vld [vmem:[#allocation6 + $0x8] sm:$0xf]  ;;  %v1619_v8 = vld [vmem:[#allocation6 + $0x10] sm:$0xf0] }
  0x47   : > { %v1478_v6 = vor.u32 %v1622_v5, %v1477_v4  ;;  %v1466_v9 = vor.u32 %v1619_v8, %v1465_v7  ;;  %s2008_s29 = smov 64   ;;  %s2009_s28 = smov 32   ;;  %v550_v1 = vand.u32 127, %v546_v62  ;;  %vm584_vm2 = vcmask 130048  }
  0x48   : > { %vm633_vm4 = vcmask 257024   ;;  %vm715_vm5 = vcmask 519424   ;;  %vm797_vm6 = vcmask 781824   ;;  %vm879_vm7 = vcmask 1044224   ;;  %s1446_s16 = sshll.u32 %s2157_s17, 5  ;;  %s1652_s13 = sshll.u32 %s2063_s22, 5 }
  0x49   : > { %485 = vmatpush.bf16.msra.mxu1 %v1494_v14  ;;  %520 = vmatpush.bf16.msra.mxu2 %v1538_v54  ;;  %v333_v14 = vld [vmem:[#allocation8] sm:$0x7]  ;;  %s293_s6 = scalar_lea.vmem [#allocation11], %s1446_s16  ;;  %s1325_s15 = scalar_lea.hbm %s2476_s5, %s1652_s13 }
  0x4a   : > { %v336_v16 = vperm.slane %v333_v14, 1  ;;  %v337_v40 = vperm.slane %v333_v14, 2  ;;  %s1326_s7 = sshll.u32 %s293_s6, 4  ;;  %s1328_s8 = sshll.u32 %s1325_s15, 4  ;;  %s1327_s7 = int_to_ptr.vmem [resolvable:$true] %s1326_s7  ;;  %s1329_s8 = int_to_ptr.hbm [resolvable:$true] %s1328_s8 }
  0x4b   : > { %s1313_s27 = scalar_lea.sflag [#allocation5], %s2157_s17  ;;  %s1938_s11 = sshra.s32 %s1329_s8, 4  ;;  %s1939_s11 = int_to_ptr.hbm [resolvable:$true] %s1938_s11 }
  0x4c   : > { %p1945_p11 = scmp.lt.s32.totalorder %s1939_s11, %s2476_s5 }
  0x4d   : > { %486 = vmatpush.bf16.msra.mxu1 %v1482_v17  ;;  %521 = vmatpush.bf16.msra.mxu2 %v1526_v58  ;;  %v335_v17 = vperm.slane %v333_v14, 0 }
  0x51   : > { %487 = vmatpush.bf16.msra.mxu1 %v1470_v20  ;;  %522 = vmatpush.bf16.msra.mxu2 %v1514_v61 }
  0x55   : > { %488 = vmatpush.bf16.msra.mxu1 %v1458_v25  ;;  %523 = vmatpush.bf16.msra.mxu2 %v1502_v0  ;;  %v547_v0 = vshrl.u32 %v546_v62, 7 }
  0x57   : > { %vm2209_vm1 = vcmp.gt.s32.totalorder %v550_v1, %v547_v0  ;;  %v548_v7 = vadd.s32 8, %v547_v0 }
  0x58   : > { %489 = vmatmul.bf16.vlgmr.msra.gmra.mxu1 %v2176_v29 }
  0x59   : > { %500 = vmatpush.bf16.msrb.mxu1 %v1546_v26  ;;  %524 = vmatpush.bf16.msra.mxu2 %v1490_v3  ;;  %vm2217_vm3 = vcmp.gt.s32.totalorder %v550_v1, %v548_v7 }
  0x5d   : > { %501 = vmatpush.bf16.msrb.mxu1 %v1534_v30  ;;  %525 = vmatpush.bf16.msra.mxu2 %v1478_v6 }
  0x61   : > { %502 = vmatpush.bf16.msrb.mxu1 %v1522_v33  ;;  %526 = vmatpush.bf16.msra.mxu2 %v1466_v9 }
  0x64   : > { %527 = vmatmul.bf16.vlgmr.msra.gmra.mxu2 %v2176_v29 }
  0x65   : > { %503 = vmatpush.bf16.msrb.mxu1 %v1510_v36 }
  0x68   : > { %494 = vmatmul.bf16.gmra.mxu1 %v1616_v42 }
  0x69   : > { %504 = vmatpush.bf16.msrb.mxu1 %v1498_v39 }
  0x6d   : > { %505 = vmatpush.bf16.msrb.mxu1 %v1486_v43 }
  0x71   : > { %506 = vmatpush.bf16.msrb.mxu1 %v1474_v51 }
  0x74   : > { %532 = vmatmul.bf16.gmra.mxu2 %v1616_v42 }
  0x75   : > { %507 = vmatpush.bf16.msrb.mxu1 %v1462_v57 }
  0x78   : > { %508 = vmatmul.bf16.vlgmr.msrb.gmra.mxu1 %v2176_v29 }
  0x88   : > { %513 = vmatmul.bf16.gmra.mxu1 %v1616_v42 }
  0xd5   : > { %v490_v10 = vpop.f32.mrf.mxu1 }
  0xd6   : > { %v491_v19 = vadd.f32 %v490_v10, %v335_v17 }
  0xdd   : > { %v492_v11 = vpop.f32.mrf.mxu1 }
  0xde   : > { %v493_v21 = vadd.f32 %v492_v11, %v335_v17 }
  0xe5   : > { %v495_v12 = vpop.f32.mrf.mxu1 }
  0xe6   : > { %v496_v37 = vadd.f32 %v495_v12, %v335_v17 }
  0xe7   : > { %v528_v41 = vpop.f32.mrf.mxu2 }
  0xe8   : > { %v529_v43 = vadd.f32 %v528_v41, %v337_v40 }
  0xea   : > { %v539_v46 = vpack.c.bf16 %v529_v43, %v529_v43 }
  0xec   : > { %v606_v50 = vunpack.c.l.b16 %v539_v46 }
  0xed   : > { %v497_v13 = vpop.f32.mrf.mxu1 }
  0xee   : > { %v498_v35 = vadd.f32 %v497_v13, %v335_v17 }
  0xef   : > { %v530_v47 = vpop.f32.mrf.mxu2 }
  0xf0   : > { %v531_v48 = vadd.f32 %v530_v47, %v337_v40 }
  0xf2   : > { %v541_v51 = vpack.c.bf16 %v531_v48, %v531_v48 }
  0xf4   : > { %v607_v53 = vunpack.c.l.b16 %v541_v51 }
  0xf5   : > { %v509_v15 = vpop.f32.mrf.mxu1 }
  0xf6   : > { %v510_v18 = vadd.f32 %v509_v15, %v336_v16  ;;  %v2196_v55 = vpack.c.b16 %v607_v53, %v606_v50 }
  0xf7   : > { %v533_v17 = vpop.f32.mrf.mxu2 }
  0xf8   : > { %v538_v22 = vpack.c.bf16 %v510_v18, %v491_v19  ;;  %v534_v18 = vadd.f32 %v533_v17, %v337_v40 }
  0xfa   : > { %v558_v25 = vunpack.c.h.b16 %v538_v22  ;;  %v555_v30 = vunpack.c.l.b16 %v538_v22  ;;  %v543_v19 = vpack.c.bf16 %v534_v18, %v534_v18 }
  0xfc   : > { %v933_v22 = vunpack.c.l.b16 %v543_v19 }
  0xfd   : > { %v511_v20 = vpop.f32.mrf.mxu1 }
  0xfe   : > { %v512_v23 = vadd.f32 %v511_v20, %v336_v16 }
  0xff   : > { %v535_v20 = vpop.f32.mrf.mxu2 }
 0x100   : > { %v540_v24 = vpack.c.bf16 %v512_v23, %v493_v21  ;;  %v536_v21 = vadd.f32 %v535_v20, %v337_v40 }
 0x102   : > { %v559_v26 = vunpack.c.h.b16 %v540_v24  ;;  %v556_v29 = vunpack.c.l.b16 %v540_v24  ;;  %v545_v23 = vpack.c.bf16 %v536_v21, %v536_v21 }
 0x104   : > { %v560_v27 = vpack.c.b16 %v559_v26, %v558_v25  ;;  %v557_v32 = vpack.c.b16 %v556_v29, %v555_v30  ;;  %v934_v24 = vunpack.c.l.b16 %v545_v23 }
 0x105   : > { %v514_v31 = vpop.f32.mrf.mxu1 }
 0x106   : > { %638 = vrot.lane.b32.xlu2 %v560_v27, %s2007_s24  ;;  %720 = vrot.lane.b32.xlu0 %v560_v27, %s2008_s29  ;;  %v566_v28 = vsel %vm561_vm0, %v560_v27, 0  ;;  %v515_v36 = vadd.f32 %v514_v31, %v336_v16  ;;  %v2227_v25 = vpack.c.b16 %v934_v24, %v933_v22 }
 0x107   : > { %575 = vmatpush.bf16.xpose.msra.mxu3 %v566_v28 }
 0x108   : > { %v542_v39 = vpack.c.bf16 %v515_v36, %v496_v37  ;;  %947 = vmatpush.bf16.msra.mxu1 %v2227_v25 }
 0x10a   : > { %v887_v44 = vunpack.c.h.b16 %v542_v39  ;;  %v884_v52 = vunpack.c.l.b16 %v542_v39 }
 0x10d   : > { %v516_v33 = vpop.f32.mrf.mxu1 }
 0x10e   : > { %636 = vrot.lane.b32.xlu2 %v557_v32, %s2007_s24  ;;  %718 = vrot.lane.b32.xlu0 %v557_v32, %s2008_s29  ;;  %v517_v34 = vadd.f32 %v516_v33, %v336_v16 }
 0x10f   : > { %1551 = vmatmul.msk.bf16.vlgmr.msra.gmra.mxu3 %vm561_vm0, %v557_v32 }
 0x110   : > { %v544_v38 = vpack.c.bf16 %v517_v34, %v498_v35  ;;  %620 = vmatpush.bf16.msrb.mxu3 %v2196_v55 }
 0x112   : > { %v888_v42 = vunpack.c.h.b16 %v544_v38  ;;  %v885_v49 = vunpack.c.l.b16 %v544_v38 }
 0x114   : > { %v2190_v45 = vpack.c.b16 %v888_v42, %v887_v44  ;;  %v2194_v54 = vpack.c.b16 %v885_v49, %v884_v52 }
 0x116   : > { %802 = vrot.lane.b32.xlu0 %v560_v27, %s2009_s28  ;;  %v894_v1 = vsel %vm561_vm0, %v2190_v45, 0 }
 0x11e   : > { %800 = vrot.lane.b32.xlu0 %v557_v32, %s2009_s28 }
 0x126   : > { %964 = vrot.lane.b32.xlu0 %v2190_v45, %s2007_s24 }
 0x12e   : > { %962 = vrot.lane.b32.xlu0 %v2194_v54, %s2007_s24 }
 0x136   : > { %1126 = vrot.lane.b32.xlu0 %v2190_v45, %s2009_s28 }
 0x13e   : > { %1045 = vrot.lane.b32.xlu0 %v2190_v45, %s2008_s29 }
 0x160   : > { %v639_v56 = vpop.permute.xlu2 %638 }
 0x161   : > { %v644_v57 = vsel %vm561_vm0, %v639_v56, 0 }
 0x162   : > { %653 = vmatpush.bf16.xpose.msra.mxu3 %v644_v57 }
 0x168   : > { %v637_v48 = vpop.permute.xlu2 %636 }
 0x178   : > { %v721_v58 = vpop.permute.xlu0 %720 }
 0x179   : > { %v726_v59 = vsel %vm561_vm0, %v721_v58, 0 }
 0x17a   : > { %735 = vmatpush.bf16.xpose.msra.mxu0 %v726_v59 }
 0x180   : > { %v719_v60 = vpop.permute.xlu0 %718 }
 0x181   : > { %1555 = vmatmul.msk.bf16.vlgmr.msra.gmra.mxu0 %vm561_vm0, %v719_v60 }
 0x188   : > { %v803_v61 = vpop.permute.xlu0 %802 }
 0x189   : > { %v808_v63 = vsel %vm561_vm0, %v803_v61, 0 }
 0x18a   : > { %817 = vmatpush.bf16.xpose.msrb.mxu2 %v808_v63 }
 0x190   : > { %v801_v2 = vpop.permute.xlu0 %800 }
 0x191   : > { %1557 = vmatmul.msk.bf16.vlgmr.msrb.gmra.mxu2 %vm561_vm0, %v801_v2 }
 0x192   : > { %v577_v4 = vpop.f32.mrf.mxu3 }
 0x193   : > { %v582_v5 = vsel %vm2209_vm1, -1e+30, %v577_v4 }
 0x194   : > { %v585_v6 = vsel %vm584_vm2, %v582_v5, -inf }
 0x195   : > { %586 = vmax.xlane.f32.xlu1 %v585_v6 }
 0x198   : > { %v965_v8 = vpop.permute.xlu0 %964 }
 0x199   : > { %v970_v10 = vsel %vm561_vm0, %v965_v8, 0 }
 0x19a   : > { %v579_v11 = vpop.f32.mrf.mxu3  ;;  %979 = vmatpush.bf16.xpose.msra.mxu2 %v970_v10 }
 0x19b   : > { %v583_v12 = vsel %vm2217_vm3, -1e+30, %v579_v11 }
 0x19c   : > { %v588_v13 = vsel %vm584_vm2, %v583_v12, -inf }
 0x19d   : > { %589 = vmax.xlane.f32.xlu1 %v588_v13 }
 0x1a0   : > { %v963_v14 = vpop.permute.xlu0 %962 }
 0x1a1   : > { %1561 = vmatmul.msk.bf16.vlgmr.msra.gmra.mxu2 %vm561_vm0, %v963_v14 }
 0x1a8   : > { %v1127_v15 = vpop.permute.xlu0 %1126 }
 0x1a9   : > { %v1132_v16 = vsel %vm561_vm0, %v1127_v15, 0 }
 0x1aa   : > { %1141 = vmatpush.bf16.xpose.msrb.mxu2 %v1132_v16 }
 0x1b0   : > { %v1046_v0 = vpop.permute.xlu0 %1045 }
 0x1b1   : > { %v1051_v4 = vsel %vm561_vm0, %v1046_v0, 0 }
 0x1fe   : > { %v737_v26 = vpop.f32.mrf.mxu0 }
 0x1ff   : > { %v742_v27 = vsel %vm2209_vm1, -1e+30, %v737_v26 }
 0x200   : > { %v744_v28 = vsel %vm584_vm2, %v742_v27, -inf }
 0x201   : > { %745 = vmax.xlane.f32.xlu1 %v744_v28 }
 0x206   : > { %v739_v29 = vpop.f32.mrf.mxu0 }
 0x207   : > { %v743_v30 = vsel %vm2217_vm3, -1e+30, %v739_v29 }
 0x208   : > { %v587_v31 = vpop.xlane.xlu1 %586  ;;  %v747_v32 = vsel %vm584_vm2, %v743_v30, -inf }
 0x209   : > { %748 = vmax.xlane.f32.xlu2 %v747_v32  ;;  %v591_v33 = vsub.f32 %v582_v5, %v587_v31 }
 0x20b   : > { %v593_v34 = vmul.f32 1.442695, %v591_v33 }
 0x20d   : > { %1740 = vpow2.f32 %v593_v34 }
 0x210   : > { %v590_v35 = vpop.xlane.xlu1 %589 }
 0x211   : > { %v592_v36 = vsub.f32 %v583_v12, %v590_v35 }
 0x213   : > { %v595_v37 = vmul.f32 1.442695, %v592_v36  ;;  %v2242_v41 = vpop.eup %1740 }
 0x214   : > { %v819_v38 = vpop.f32.mrf.mxu2 }
 0x215   : > { %1742 = vpow2.f32 %v595_v37  ;;  %v2238_v39 = vsel %vm2209_vm1, -1e+30, %v819_v38 }
 0x216   : > { %v826_v40 = vsel %vm584_vm2, %v2238_v39, -inf }
 0x217   : > { %827 = vmax.xlane.f32.xlu2 %v826_v40 }
 0x21a   : > { %763 = vrot.lane.b32.xlu1 %v2196_v55, %s2008_s29 }
 0x21b   : > { %v2246_v42 = vpop.eup %1742 }
 0x21c   : > { %v821_v43 = vpop.f32.mrf.mxu2  ;;  %v603_v44 = vpack.c.bf16 %v2246_v42, %v2242_v41 }
 0x21d   : > { %v2266_v51 = vsel %vm2217_vm3, -1e+30, %v821_v43 }
 0x21e   : > { %1552 = vmatmul.msk.bf16.vlgmr.msrb.gmra.mxu3 %vm584_vm2, %v603_v44  ;;  %v829_v52 = vsel %vm584_vm2, %v2266_v51, -inf }
 0x222   : > { %1124 = vrot.lane.b32.xlu1 %v2194_v54, %s2009_s28 }
 0x224   : > { %v981_v46 = vpop.f32.mrf.mxu2 }
 0x225   : > { %v2300_v15 = vsel %vm2209_vm1, -1e+30, %v981_v46 }
 0x226   : > { %v988_v16 = vsel %vm584_vm2, %v2300_v15, -inf }
 0x22a   : > { %1043 = vrot.lane.b32.xlu1 %v2194_v54, %s2008_s29 }
 0x22c   : > { %v983_v47 = vpop.f32.mrf.mxu2 }
 0x22d   : > { %v2257_v49 = vsel %vm2217_vm3, -1e+30, %v983_v47 }
 0x22e   : > { %1553 = vmatmul.msk.bf16.vlgmr.msra.gmra.mxu3 %vm561_vm0, %v637_v48  ;;  %v991_v50 = vsel %vm584_vm2, %v2257_v49, -inf }
 0x22f   : > { %992 = vmax.xlane.f32.xlu0 %v991_v50 }
 0x232   : > { %681 = vrot.lane.b32.xlu1 %v2196_v55, %s2007_s24 }
 0x25c   : > { %830 = vmax.xlane.f32.xlu1 %v829_v52 }
 0x274   : > { %v746_v53 = vpop.xlane.xlu1 %745 }
 0x275   : > { %v750_v58 = vsub.f32 %v742_v27, %v746_v53 }
 0x277   : > { %v752_v60 = vmul.f32 1.442695, %v750_v58 }
 0x27c   : > { %v749_v56 = vpop.xlane.xlu2 %748 }
 0x27d   : > { %v751_v57 = vsub.f32 %v743_v30, %v749_v56 }
 0x27f   : > { %v754_v59 = vmul.f32 1.442695, %v751_v57 }
 0x281   : > { %1744 = vpow2.f32 %v754_v59 }
 0x282   : > { %1746 = vpow2.f32 %v752_v60 }
 0x287   : > { %v2270_v61 = vpop.eup %1744 }
 0x288   : > { %v2272_v63 = vpop.eup %1746 }
 0x289   : > { %v762_v2 = vpack.c.bf16 %v2270_v61, %v2272_v63  ;;  %v756_v59 = vsel %vm584_vm2, %v2272_v63, 0.0 }
 0x28a   : > { %v828_v23 = vpop.xlane.xlu2 %827 }
 0x28b   : > { %v832_v58 = vsub.f32 %v2238_v39, %v828_v23 }
 0x28c   : > { %v764_v62 = vpop.permute.xlu1 %763 }
 0x28d   : > { %776 = vmatpush.bf16.msrb.mxu0 %v764_v62  ;;  %v834_v60 = vmul.f32 1.442695, %v832_v58 }
 0x290   : > { %1556 = vmatmul.msk.bf16.vlgmr.msrb.gmra.mxu0 %vm584_vm2, %v762_v2 }
 0x291   : > { %903 = vmatpush.bf16.xpose.msra.mxu0 %v894_v1 }
 0x294   : > { %v1125_v5 = vpop.permute.xlu1 %1124 }
 0x295   : > { %1565 = vmatmul.msk.bf16.vlgmr.msrb.gmra.mxu2 %vm561_vm0, %v1125_v5 }
 0x299   : > { %1060 = vmatpush.bf16.xpose.msrb.mxu0 %v1051_v4 }
 0x29c   : > { %v1044_v6 = vpop.permute.xlu1 %1043 }
 0x2a0   : > { %1559 = vmatmul.msk.bf16.vlgmr.msra.gmra.mxu0 %vm561_vm0, %v2194_v54 }
 0x2a1   : > { %v2283_v7 = vpop.f32.mrf.mxu3 }
 0x2a2   : > { %v993_v28 = vpop.xlane.xlu0 %992 }
 0x2a3   : > { %v995_v2 = vsub.f32 %v2257_v49, %v993_v28  ;;  %v597_v28 = vsel %vm584_vm2, %v2242_v41, 0.0 }
 0x2a4   : > { %v682_v8 = vpop.permute.xlu1 %681 }
 0x2a5   : > { %694 = vmatpush.bf16.msrb.mxu3 %v682_v8  ;;  %v998_v4 = vmul.f32 1.442695, %v995_v2 }
 0x2a9   : > { %v2285_v45 = vpop.f32.mrf.mxu3 }
 0x2b0   : > { %1563 = vmatmul.msk.bf16.vlgmr.msrb.gmra.mxu0 %vm561_vm0, %v1044_v6 }
 0x2b1   : > { %v655_v10 = vpop.f32.mrf.mxu3 }
 0x2b2   : > { %v660_v11 = vsel %vm2209_vm1, -1e+30, %v655_v10 }
 0x2b3   : > { %v662_v12 = vsel %vm584_vm2, %v660_v11, -inf }
 0x2b4   : > { %663 = vmax.xlane.f32.xlu2 %v662_v12 }
 0x2b9   : > { %v657_v13 = vpop.f32.mrf.mxu3 }
 0x2ba   : > { %v661_v14 = vsel %vm2217_vm3, -1e+30, %v657_v13 }
 0x2bb   : > { %v665_v54 = vsel %vm584_vm2, %v661_v14, -inf }
 0x2bc   : > { %666 = vmax.xlane.f32.xlu0 %v665_v54 }
 0x2cc   : > { %845 = vrot.lane.b32.xlu2 %v2196_v55, %s2009_s28 }
 0x2cf   : > { %v831_v48 = vpop.xlane.xlu1 %830 }
 0x2d0   : > { %1007 = vrot.lane.b32.xlu0 %v2227_v25, %s2007_s24  ;;  %v833_v56 = vsub.f32 %v2266_v51, %v831_v48  ;;  %v759_v51 = vsel %vm584_vm2, %v2270_v61, 0.0 }
 0x2d2   : > { %v836_v9 = vmul.f32 1.442695, %v833_v56 }
 0x2f5   : > { %989 = vmax.xlane.f32.xlu2 %v988_v16 }
 0x30d   : > { %v2304_v17 = vpop.f32.mrf.mxu0 }
 0x315   : > { %v2306_v18 = vpop.f32.mrf.mxu0 }
 0x318   : > { %v1143_v19 = vpop.f32.mrf.mxu2 }
 0x319   : > { %v2310_v20 = vsel %vm2209_vm1, -1e+30, %v1143_v19 }
 0x31a   : > { %v1150_v55 = vsel %vm584_vm2, %v2310_v20, -inf }
 0x31b   : > { %1151 = vmax.xlane.f32.xlu1 %v1150_v55 }
 0x31d   : > { %v905_v21 = vpop.f32.mrf.mxu0 }
 0x31e   : > { %v2316_v22 = vsel %vm2209_vm1, -1e+30, %v905_v21 }
 0x31f   : > { %v912_v24 = vsel %vm584_vm2, %v2316_v22, -inf }
 0x320   : > { %913 = vmax.xlane.f32.xlu0 %v912_v24  ;;  %v1145_v31 = vpop.f32.mrf.mxu2 }
 0x321   : > { %v2328_v33 = vsel %vm2217_vm3, -1e+30, %v1145_v31 }
 0x322   : > { %v1153_v40 = vsel %vm584_vm2, %v2328_v33, -inf }
 0x325   : > { %v907_v26 = vpop.f32.mrf.mxu0 }
 0x326   : > { %v2322_v27 = vsel %vm2217_vm3, -1e+30, %v907_v26 }
 0x327   : > { %v664_v29 = vpop.xlane.xlu2 %663  ;;  %v915_v30 = vsel %vm584_vm2, %v2322_v27, -inf }
 0x328   : > { %916 = vmax.xlane.f32.xlu1 %v915_v30  ;;  %v668_v32 = vsub.f32 %v660_v11, %v664_v29 }
 0x32a   : > { %v670_v36 = vmul.f32 1.442695, %v668_v32 }
 0x32c   : > { %1748 = vpow2.f32 %v670_v36 }
 0x32d   : > { %v1062_v34 = vpop.f32.mrf.mxu0 }
 0x32e   : > { %v2332_v35 = vsel %vm2209_vm1, -1e+30, %v1062_v34 }
 0x32f   : > { %v846_v37 = vpop.permute.xlu2 %845  ;;  %v667_v38 = vpop.xlane.xlu0 %666  ;;  %v1069_v43 = vsel %vm584_vm2, %v2332_v35, -inf }
 0x330   : > { %v669_v44 = vsub.f32 %v661_v14, %v667_v38  ;;  %858 = vmatpush.bf16.msra.mxu3 %v846_v37  ;;  %1154 = vmax.xlane.f32.xlu1 %v1153_v40 }
 0x331   : > { %1070 = vmax.xlane.f32.xlu2 %v1069_v43 }
 0x332   : > { %v672_v46 = vmul.f32 1.442695, %v669_v44  ;;  %v2346_v52 = vpop.eup %1748 }
 0x333   : > { %v674_v58 = vsel %vm584_vm2, %v2346_v52, 0.0 }
 0x334   : > { %1750 = vpow2.f32 %v672_v46  ;;  %1169 = vrot.lane.b32.xlu0 %v2227_v25, %s2009_s28 }
 0x335   : > { %v1064_v3 = vpop.f32.mrf.mxu0  ;;  %1752 = vpow2.f32 %v836_v9 }
 0x336   : > { %v2342_v47 = vsel %vm2217_vm3, -1e+30, %v1064_v3  ;;  %1754 = vpow2.f32 %v834_v60 }
 0x337   : > { %v1072_v50 = vsel %vm584_vm2, %v2342_v47, -inf  ;;  %1756 = vpow2.f32 %v998_v4 }
 0x338   : > { %1073 = vmax.xlane.f32.xlu1 %v1072_v50 }
 0x33a   : > { %v2348_v53 = vpop.eup %1750 }
 0x33b   : > { %v680_v57 = vpack.c.bf16 %v2348_v53, %v2346_v52  ;;  %v1753_v0 = vpop.eup %1752  ;;  %v677_v41 = vsel %vm584_vm2, %v2348_v53, 0.0 }
 0x33c   : > { %v1755_v39 = vpop.eup %1754  ;;  %v841_v63 = vsel %vm584_vm2, %v1753_v0, 0.0 }
 0x33d   : > { %1554 = vmatmul.msk.bf16.vlgmr.msrb.gmra.mxu3 %vm584_vm2, %v680_v57  ;;  %v844_v1 = vpack.c.bf16 %v1753_v0, %v1755_v39  ;;  %v838_v61 = vsel %vm584_vm2, %v1755_v39, 0.0  ;;  %v1757_v10 = vpop.eup %1756 }
 0x33e   : > { %v1003_v49 = vsel %vm584_vm2, %v1757_v10, 0.0 }
 0x340   : > { %757 = vadd.xlane.f32.xlu1 %v756_v59 }
 0x342   : > { %v1008_v62 = vpop.permute.xlu0 %1007 }
 0x343   : > { %1020 = vmatpush.bf16.msrb.mxu3 %v1008_v62 }
 0x348   : > { %760 = vadd.xlane.f32.xlu1 %v759_v51 }
 0x349   : > { %1088 = vrot.lane.b32.xlu2 %v2227_v25, %s2008_s29 }
 0x34d   : > { %1558 = vmatmul.msk.bf16.vlgmr.msra.gmra.mxu3 %vm584_vm2, %v844_v1 }
 0x350   : > { %842 = vadd.xlane.f32.xlu1 %v841_v63 }
 0x368   : > { %v990_v5 = vpop.xlane.xlu2 %989 }
 0x369   : > { %v994_v6 = vsub.f32 %v2300_v15, %v990_v5 }
 0x36b   : > { %v996_v8 = vmul.f32 1.442695, %v994_v6 }
 0x36d   : > { %1758 = vpow2.f32 %v996_v8 }
 0x372   : > { %839 = vadd.xlane.f32.xlu2 %v838_v61 }
 0x373   : > { %v1759_v25 = vpop.eup %1758 }
 0x374   : > { %v1006_v11 = vpack.c.bf16 %v1757_v10, %v1759_v25  ;;  %v1000_v12 = vsel %vm584_vm2, %v1759_v25, 0.0 }
 0x375   : > { %1001 = vadd.xlane.f32.xlu1 %v1000_v12 }
 0x376   : > { %1562 = vmatmul.msk.bf16.vlgmr.msrb.gmra.mxu3 %vm584_vm2, %v1006_v11 }
 0x37d   : > { %1004 = vadd.xlane.f32.xlu1 %v1003_v49 }
 0x38e   : > { %v1152_v13 = vpop.xlane.xlu1 %1151 }
 0x38f   : > { %v1156_v14 = vsub.f32 %v2310_v20, %v1152_v13 }
 0x391   : > { %v1158_v54 = vmul.f32 1.442695, %v1156_v14 }
 0x393   : > { %1760 = vpow2.f32 %v1158_v54  ;;  %v914_v15 = vpop.xlane.xlu0 %913 }
 0x394   : > { %v918_v16 = vsub.f32 %v2316_v22, %v914_v15 }
 0x396   : > { %v920_v21 = vmul.f32 1.442695, %v918_v16 }
 0x398   : > { %1762 = vpow2.f32 %v920_v21 }
 0x399   : > { %v1761_v19 = vpop.eup %1760 }
 0x39a   : > { %v1162_v55 = vsel %vm584_vm2, %v1761_v19, 0.0 }
 0x39b   : > { %1163 = vadd.xlane.f32.xlu0 %v1162_v55  ;;  %v917_v23 = vpop.xlane.xlu1 %916 }
 0x39c   : > { %v919_v24 = vsub.f32 %v2322_v27, %v917_v23 }
 0x39e   : > { %v922_v26 = vmul.f32 1.442695, %v919_v24  ;;  %v2376_v22 = vpop.eup %1762 }
 0x3a0   : > { %1764 = vpow2.f32 %v922_v26 }
 0x3a3   : > { %598 = vadd.xlane.f32.xlu0 %v597_v28  ;;  %v1155_v20 = vpop.xlane.xlu1 %1154 }
 0x3a4   : > { %v1071_v29 = vpop.xlane.xlu2 %1070  ;;  %v1157_v30 = vsub.f32 %v2328_v33, %v1155_v20 }
 0x3a5   : > { %v1075_v31 = vsub.f32 %v2332_v35, %v1071_v29 }
 0x3a6   : > { %v1765_v32 = vpop.eup %1764  ;;  %v1160_v34 = vmul.f32 1.442695, %v1157_v30  ;;  %v1170_v36 = vpop.permute.xlu0 %1169 }
 0x3a7   : > { %v930_v27 = vpack.c.bf16 %v1765_v32, %v2376_v22  ;;  %v1077_v37 = vmul.f32 1.442695, %v1075_v31  ;;  %1182 = vmatpush.bf16.msra.mxu3 %v1170_v36  ;;  %v927_v52 = vsel %vm584_vm2, %v1765_v32, 0.0 }
 0x3a8   : > { %1766 = vpow2.f32 %v1160_v34 }
 0x3a9   : > { %1768 = vpow2.f32 %v1077_v37  ;;  %1560 = vmatmul.msk.bf16.vlgmr.msra.gmra.mxu1 %vm584_vm2, %v930_v27 }
 0x3ab   : > { %678 = vadd.xlane.f32.xlu0 %v677_v41  ;;  %v1074_v33 = vpop.xlane.xlu1 %1073 }
 0x3ac   : > { %v1089_v38 = vpop.permute.xlu2 %1088  ;;  %v1076_v40 = vsub.f32 %v2342_v47, %v1074_v33  ;;  %v600_v47 = vsel %vm584_vm2, %v2246_v42, 0.0 }
 0x3ad   : > { %1101 = vmatpush.bf16.msrb.mxu1 %v1089_v38 }
 0x3ae   : > { %v1767_v35 = vpop.eup %1766  ;;  %v1079_v43 = vmul.f32 1.442695, %v1076_v40 }
 0x3af   : > { %v1769_v44 = vpop.eup %1768  ;;  %v1168_v46 = vpack.c.bf16 %v1767_v35, %v1761_v19  ;;  %v1165_v3 = vsel %vm584_vm2, %v1767_v35, 0.0 }
 0x3b0   : > { %1770 = vpow2.f32 %v1079_v43  ;;  %1166 = vadd.xlane.f32.xlu1 %v1165_v3  ;;  %v1081_v48 = vsel %vm584_vm2, %v1769_v44, 0.0  ;;  %v924_v3 = vsel %vm584_vm2, %v2376_v22, 0.0 }
 0x3b1   : > { %1566 = vmatmul.msk.bf16.vlgmr.msra.gmra.mxu3 %vm584_vm2, %v1168_v46 }
 0x3b3   : > { %1082 = vadd.xlane.f32.xlu0 %v1081_v48  ;;  %v758_v50 = vpop.xlane.xlu1 %757 }
 0x3b6   : > { %v1771_v53 = vpop.eup %1770 }
 0x3b7   : > { %v1087_v56 = vpack.c.bf16 %v1771_v53, %v1769_v44  ;;  %v1084_v62 = vsel %vm584_vm2, %v1771_v53, 0.0 }
 0x3b8   : > { %601 = vadd.xlane.f32.xlu1 %v600_v47 }
 0x3b9   : > { %1564 = vmatmul.msk.bf16.vlgmr.msrb.gmra.mxu1 %vm584_vm2, %v1087_v56 }
 0x3bb   : > { %v761_v57 = vpop.xlane.xlu1 %760 }
 0x3bc   : > { %1772 = vrcp.f32 %v761_v57 }
 0x3bd   : > { %1774 = vrcp.f32 %v758_v50 }
 0x3c0   : > { %675 = vadd.xlane.f32.xlu1 %v674_v58  ;;  %v696_v2 = vpop.f32.mrf.mxu3 }
 0x3c2   : > { %v1773_v9 = vpop.eup %1772 }
 0x3c3   : > { %v786_v59 = vmul.f32 %v1773_v9, %v2306_v18  ;;  %v1775_v42 = vpop.eup %1774  ;;  %v843_v39 = vpop.xlane.xlu1 %842 }
 0x3c4   : > { %v785_v51 = vmul.f32 %v1775_v42, %v2304_v17  ;;  %v1649_v42 = vld [vmem:[#allocation9 + $0x30] sm:$0xff] }
 0x3c5   : > { %v788_v60 = vpack.c.bf16 %v786_v59, %v786_v59  ;;  %v1650_v59 = vld [vmem:[#allocation9 + $0x38] sm:$0xff] }
 0x3c6   : > { %v787_v0 = vpack.c.bf16 %v785_v51, %v785_v51  ;;  %1289 = vmatpush.bf16.msra.mxu0 %v1650_v59 }
 0x3c7   : > { %793 = vrot.lane.b32.xlu2 %v788_v60, %s2008_s29 }
 0x3c8   : > { %1085 = vadd.xlane.f32.xlu1 %v1084_v62  ;;  %v698_v10 = vpop.f32.mrf.mxu3 }
 0x3ca   : > { %1290 = vmatpush.bf16.msra.mxu0 %v1649_v42 }
 0x3d0   : > { %v860_v14 = vpop.f32.mrf.mxu3 }
 0x3d8   : > { %v862_v26 = vpop.f32.mrf.mxu3 }
 0x3e1   : > { %791 = vrot.lane.b32.xlu1 %v787_v0, %s2008_s29 }
 0x3e5   : > { %v840_v17 = vpop.xlane.xlu2 %839 }
 0x3e8   : > { %v1002_v18 = vpop.xlane.xlu1 %1001 }
 0x3f0   : > { %v1005_v4 = vpop.xlane.xlu1 %1004 }
 0x3f9   : > { %v1022_v31 = vpop.f32.mrf.mxu3 }
 0x401   : > { %v1024_v37 = vpop.f32.mrf.mxu3 }
 0x40b   : > { %928 = vadd.xlane.f32.xlu1 %v927_v52 }
 0x40e   : > { %v2398_v1 = vpop.xlane.xlu0 %1163 }
 0x416   : > { %v599_v63 = vpop.xlane.xlu0 %598 }
 0x417   : > { %1776 = vrcp.f32 %v599_v63 }
 0x41d   : > { %v1777_v5 = vpop.eup %1776 }
 0x41e   : > { %v629_v6 = vmul.f32 %v1777_v5, %v2283_v7  ;;  %v679_v8 = vpop.xlane.xlu0 %678  ;;  %v1644_v5 = vld [vmem:[#allocation9 + $0x8] sm:$0xff] }
 0x41f   : > { %1778 = vrcp.f32 %v679_v8 }
 0x420   : > { %v631_v61 = vpack.c.bf16 %v629_v6, %v629_v6  ;;  %1780 = vrcp.f32 %v840_v17  ;;  %v1643_v17 = vld [vmem:[#allocation9] sm:$0xff] }
 0x422   : > { %634 = vst.msk [vmem:[#allocation2] sm:$0xf] %vm633_vm4, %v631_v61  ;;  %v794_v61 = vpop.permute.xlu2 %793 }
 0x423   : > { %v1167_v25 = vpop.xlane.xlu1 %1166 }
 0x425   : > { %v1779_v11 = vpop.eup %1778 }
 0x426   : > { %v704_v12 = vmul.f32 %v1779_v11, %v698_v10  ;;  %v1781_v13 = vpop.eup %1780  ;;  %v2407_v30 = vpop.f32.mrf.mxu1 }
 0x427   : > { %v867_v7 = vmul.f32 %v1781_v13, %v860_v14  ;;  %v1083_v41 = vpop.xlane.xlu0 %1082 }
 0x428   : > { %v706_v49 = vpack.c.bf16 %v704_v12, %v704_v12 }
 0x429   : > { %v869_v15 = vpack.c.bf16 %v867_v7, %v867_v7 }
 0x42a   : > { %711 = vrot.lane.b32.xlu0 %v706_v49, %s2009_s28 }
 0x42b   : > { %v602_v54 = vpop.xlane.xlu1 %601 }
 0x42c   : > { %1782 = vrcp.f32 %v602_v54 }
 0x42e   : > { %v951_v36 = vpop.f32.mrf.mxu1 }
 0x432   : > { %v1783_v16 = vpop.eup %1782  ;;  %873 = vrot.lane.b32.xlu0 %v869_v15, %s2007_s24 }
 0x433   : > { %v630_v19 = vmul.f32 %v1783_v16, %v2285_v45  ;;  %v676_v55 = vpop.xlane.xlu1 %675 }
 0x434   : > { %1784 = vrcp.f32 %v676_v55  ;;  %v1184_v48 = vpop.f32.mrf.mxu3 }
 0x435   : > { %v632_v21 = vpack.c.bf16 %v630_v19, %v630_v19  ;;  %1786 = vrcp.f32 %v843_v39  ;;  %v1648_v39 = vld [vmem:[#allocation9 + $0x28] sm:$0xff] }
 0x436   : > { %1788 = vrcp.f32 %v1002_v18  ;;  %v1103_v43 = vpop.f32.mrf.mxu1  ;;  %1291 = vmatpush.bf16.msra.mxu0 %v1648_v39  ;;  %v1646_v18 = vld [vmem:[#allocation9 + $0x18] sm:$0xff] }
 0x437   : > { %635 = vst.msk [vmem:[#allocation2 + $0x4] sm:$0xf] %vm633_vm4, %v632_v21  ;;  %1790 = vrcp.f32 %v1005_v4 }
 0x438   : > { %1792 = vrcp.f32 %v1083_v41 }
 0x43a   : > { %v1785_v23 = vpop.eup %1784 }
 0x43b   : > { %v703_v24 = vmul.f32 %v1785_v23, %v696_v2  ;;  %v1787_v20 = vpop.eup %1786  ;;  %v1086_v35 = vpop.xlane.xlu1 %1085  ;;  %v1645_v2 = vld [vmem:[#allocation9 + $0x10] sm:$0xff] }
 0x43c   : > { %v868_v29 = vmul.f32 %v1787_v20, %v862_v26  ;;  %v1789_v45 = vpop.eup %1788  ;;  %1794 = vrcp.f32 %v1086_v35  ;;  %v1186_v58 = vpop.f32.mrf.mxu3  ;;  %v1739_v26 = vld [vmem:[%s2475_s4] ss:$0 sm:$0xff] }
 0x43d   : > { %v705_v28 = vpack.c.bf16 %v703_v24, %v703_v24  ;;  %v1029_v34 = vmul.f32 %v1789_v45, %v1022_v31  ;;  %v1791_v33 = vpop.eup %1790  ;;  %1796 = vrcp.f32 %v2398_v1  ;;  %v1647_v1 = vld [vmem:[#allocation9 + $0x20] sm:$0xff] }
 0x43e   : > { %v870_v32 = vpack.c.bf16 %v868_v29, %v868_v29  ;;  %v1030_v38 = vmul.f32 %v1791_v33, %v1024_v37  ;;  %v1793_v44 = vpop.eup %1792  ;;  %v1105_v56 = vpop.f32.mrf.mxu1  ;;  %1798 = vrcp.f32 %v1167_v25  ;;  %1292 = vmatpush.bf16.msra.mxu0 %v1647_v1 }
 0x43f   : > { %709 = vrot.lane.b32.xlu2 %v705_v28, %s2009_s28  ;;  %v1031_v27 = vpack.c.bf16 %v1029_v34, %v1029_v34  ;;  %v1110_v46 = vmul.f32 %v1793_v44, %v1103_v43 }
 0x440   : > { %v1032_v40 = vpack.c.bf16 %v1030_v38, %v1030_v38 }
 0x441   : > { %v1112_v50 = vpack.c.bf16 %v1110_v46, %v1110_v46 }
 0x442   : > { %v1795_v53 = vpop.eup %1794  ;;  %1293 = vmatpush.bf16.msra.mxu0 %v1646_v18 }
 0x443   : > { %v1111_v47 = vmul.f32 %v1795_v53, %v1105_v56  ;;  %v1797_v9 = vpop.eup %1796 }
 0x444   : > { %v1799_v60 = vpop.eup %1798  ;;  %v1191_v62 = vmul.f32 %v1797_v9, %v1184_v48 }
 0x445   : > { %v1113_v57 = vpack.c.bf16 %v1111_v47, %v1111_v47  ;;  %v1192_v22 = vmul.f32 %v1799_v60, %v1186_v58 }
 0x446   : > { %v1193_v51 = vpack.c.bf16 %v1191_v62, %v1191_v62  ;;  %1294 = vmatpush.bf16.msra.mxu0 %v1645_v2 }
 0x447   : > { %875 = vrot.lane.b32.xlu2 %v870_v32, %s2007_s24  ;;  %v1194_v0 = vpack.c.bf16 %v1192_v22, %v1192_v22 }
 0x44a   : > { %1295 = vmatpush.bf16.msra.mxu0 %v1644_v5 }
 0x44e   : > { %1296 = vmatpush.bf16.msra.mxu0 %v1643_v17 }
 0x44f   : > { %1035 = vrot.lane.b32.xlu2 %v1031_v27, %s2009_s28 }
 0x453   : > { %v792_v52 = vpop.permute.xlu1 %791 }
 0x457   : > { %1037 = vrot.lane.b32.xlu2 %v1032_v40, %s2009_s28  ;;  %s1944_s28 = scalar_lea.hbm %s2476_s5, 64 }
 0x45c   : > { %925 = vadd.xlane.f32.xlu0 %v924_v3 }
 0x45f   : > { %1116 = vrot.lane.b32.xlu2 %v1112_v50, %s2008_s29 }
 0x467   : > { %1118 = vrot.lane.b32.xlu2 %v1113_v57, %s2008_s29 }
 0x46f   : > { %1197 = vrot.lane.b32.xlu2 %v1193_v51, %s2007_s24 }
 0x470   : > { %1199 = vrot.lane.b32.xlu0 %v1194_v0, %s2007_s24  ;;  %s1940_s24 = scalar_lea.hbm %s1939_s11, 32 }
 0x471   : > { %p1941_p1 = scmp.ne.s32.totalorder %s1939_s11, %s1940_s24  ;;  %p1946_p9 = scmp.lt.s32.totalorder %s1944_s28, %s1940_s24 }
 0x473   : > { %p1942_p4 = pnand %p1941_p1, %p2127_p3  ;;  %p1947_p2 = por %p1946_p9, %p1945_p11 }
 0x475   : > { %p1943_p8 = pneg %p1942_p4 }
 0x477   : > { %p1948_p10 = pnand %p1947_p2, %p1943_p8 }
 0x47e   : > { %v929_v63 = vpop.xlane.xlu1 %928 }
 0x47f   : > { %1800 = vrcp.f32 %v929_v63 }
 0x485   : > { %v1801_v4 = vpop.eup %1800 }
 0x486   : > { %v957_v6 = vmul.f32 %v1801_v4, %v951_v36 }
 0x488   : > { %v959_v8 = vpack.c.bf16 %v957_v6, %v957_v6 }
 0x48a   : > { %961 = vst.msk [vmem:[#allocation2 + $0xc] sm:$0xf] %vm633_vm4, %v959_v8 }
 0x499   : > { %v710_v10 = vpop.permute.xlu2 %709 }
 0x49a   : > { %716 = vst.msk [vmem:[#allocation2] sm:$0xf] %vm715_vm5, %v710_v10 }
 0x49b   : > { %798 = vst.msk [vmem:[#allocation2] sm:$0xf] %vm797_vm6, %v792_v52 }
 0x49c   : > { %v712_v25 = vpop.permute.xlu0 %711 }
 0x49d   : > { %717 = vst.msk [vmem:[#allocation2 + $0x4] sm:$0xf] %vm715_vm5, %v712_v25 }
 0x49e   : > { %799 = vst.msk [vmem:[#allocation2 + $0x4] sm:$0xf] %vm797_vm6, %v794_v61 }
 0x4a1   : > { %v876_v11 = vpop.permute.xlu2 %875 }
 0x4a2   : > { %881 = vst.msk [vmem:[#allocation2 + $0x4] sm:$0xf] %vm879_vm7, %v876_v11 }
 0x4a4   : > { %v874_v12 = vpop.permute.xlu0 %873 }
 0x4a5   : > { %880 = vst.msk [vmem:[#allocation2] sm:$0xf] %vm879_vm7, %v874_v12 }
 0x4a9   : > { %v1036_v49 = vpop.permute.xlu2 %1035 }
 0x4ac   : > { %v1641_v13 = vld [vmem:[#allocation2] sm:$0xff] }
 0x4ad   : > { %1297 = vmatmul.bf16.vlgmr.msra.gmra.mxu0 %v1641_v13 }
 0x4b1   : > { %v1038_v14 = vpop.permute.xlu2 %1037 }
 0x4b2   : > { %1042 = vst.msk [vmem:[#allocation2 + $0xc] sm:$0xf] %vm715_vm5, %v1038_v14 }
 0x4b9   : > { %v1117_v54 = vpop.permute.xlu2 %1116 }
 0x4c1   : > { %v1119_v7 = vpop.permute.xlu2 %1118 }
 0x4c2   : > { %1123 = vst.msk [vmem:[#allocation2 + $0xc] sm:$0xf] %vm797_vm6, %v1119_v7 }
 0x4c9   : > { %v1198_v21 = vpop.permute.xlu2 %1197 }
 0x4cf   : > { %v926_v15 = vpop.xlane.xlu0 %925 }
 0x4d0   : > { %1802 = vrcp.f32 %v926_v15 }
 0x4d6   : > { %v1803_v16 = vpop.eup %1802 }
 0x4d7   : > { %v956_v19 = vmul.f32 %v1803_v16, %v2407_v30 }
 0x4d9   : > { %v958_v55 = vpack.c.bf16 %v956_v19, %v956_v19 }
 0x4db   : > { %960 = vst.msk [vmem:[#allocation2 + $0x8] sm:$0xf] %vm633_vm4, %v958_v55 }
 0x4dc   : > { %1041 = vst.msk [vmem:[#allocation2 + $0x8] sm:$0xf] %vm715_vm5, %v1036_v49 }
 0x4dd   : > { %1122 = vst.msk [vmem:[#allocation2 + $0x8] sm:$0xf] %vm797_vm6, %v1117_v54 }
 0x4de   : > { %1203 = vst.msk [vmem:[#allocation2 + $0x8] sm:$0xf] %vm879_vm7, %v1198_v21 }
 0x4e2   : > { %v1200_v23 = vpop.permute.xlu0 %1199 }
 0x4e3   : > { %1204 = vst.msk [vmem:[#allocation2 + $0xc] sm:$0xf] %vm879_vm7, %v1200_v23 }
 0x4ea   : > { %v1642_v24 = vld [vmem:[#allocation2 + $0x8] sm:$0xff] }
 0x4eb   : > { %1302 = vmatmul.bf16.gmra.mxu0 %v1642_v24 }
 0x52a   : > { %v1298_v28 = vpop.f32.mrf.mxu0 }
 0x52b   : > { %v1299_v20 = vadd.f32 %v1739_v26, %v1298_v28 }
 0x52d   : > { %1308 = vst [vmem:[%s293_s6] sm:$0xff] %v1299_v20 }
 0x532   : > { %v1300_v29 = vpop.f32.mrf.mxu0 }
 0x533   : > { %v1301_v30 = vadd.f32 %v1739_v26, %v1300_v29 }
 0x535   : > { %1309 = vst [vmem:[%s293_s6 + $0x8] sm:$0xff] %v1301_v30 }
 0x568   : > { %v1303_v31 = vpop.f32.mrf.mxu0 }
 0x569   : > { %v1304_v32 = vadd.f32 %v1739_v26, %v1303_v31 }
 0x56b   : > { %1310 = vst [vmem:[%s293_s6 + $0x10] sm:$0xff] %v1304_v32 }
 0x570   : > { %v1305_v45 = vpop.f32.mrf.mxu0 }
 0x571   : > { %v1306_v34 = vadd.f32 %v1739_v26, %v1305_v45 }
 0x573   : > { %1311 = vst [vmem:[%s293_s6 + $0x18] sm:$0xff] %v1306_v34 }
 0x574   : > { %1951 = shalt.err (!%p1948_p10)
}
 0x575   : > { %s2010_s17 = smov 128   ;;  %s2011_s26 = smov 8  }
 0x576   : > { %1667 = dma.vmem_to_hbm [thread:$0]  (%p2127_p3), %s1327_s7, 512, %s1329_s8, %s1313_s27, %s2010_s17, %s2010_s17, %s2011_s26  }
 0x577 PF: > { %s1343_s6 = sand.u32 1, %s1986_s18   ;;  %p2489_p12 = scmp.ge.s32.totalorder %s1998_s21, 2 }
 0x578   : > { %s1344_s13 = scalar_lea.sflag [#allocation5], %s1343_s6 }
 0x579   : > { %p1684_p13 = pnand %p2489_p12, %p2077_p6 }
 0x57b   : > { %p1685_p0 = pneg %p1684_p13 }
 0x57d   : > { %1981 = dma.done.wait (%p1685_p0), %s1344_s13, 512  }
 0x57e   : > { %1983 = vsyncadd (%p1685_p0), %s1344_s13, 4294966784  ;;  %p20_p5 = scmp.ge.s32.totalorder %s2114_s30, 4   ;;  %s2490_s18 = smov %s1990_s19 }
 0x57f   : > { %s2491_s19 = smov %s1994_s20  ;;  %s2492_s20 = smov %s2123_s9 }
 0x580   : > { %s2493_s21 = smov %s2114_s30  ;;  %22 = sbr.rel (!%p20_p5) target bundleno = 7 (0x7), region = 97 }
 0x585   :  { %1350 = vsyncpa [#allocation4], 1 }
 0x586   :  { %1352 = vsyncpa [#allocation4 + $0x1], 1 }
 0x587   :  { %1353 = vsyncpa [#allocation7], 1 }
 0x588   :  { %1354 = vsyncpa [#allocation10], 1 }
 0x589   :  { %1355 = vsyncpa [#allocation5], 1 }
 0x58a   :  { %1357 = vsyncpa [#allocation5 + $0x1], 1 }

</bundles_post_ra>
